<compile_context>
chip_gen: v6e
topology: v6e:2x2x1
jax: 0.10.0
libtpu: 0.0.40
codegen_flags: <defaults>
</compile_context>

<pallas_src>
import math

import jax
import jax.numpy as jnp
from jax import lax
from jax.experimental import pallas as pl
from jax.experimental.pallas import tpu as pltpu


def _layer_norm(x, gamma, beta, eps=1e-5):
    mu = jnp.mean(x, axis=-1, keepdims=True)
    xc = x - mu
    var = jnp.mean(xc * xc, axis=-1, keepdims=True)
    return xc * lax.rsqrt(var + eps) * gamma + beta


def multimodal_transformer_kernel(
        xy_ref, w_in_ref, b_in_ref,
        wq_ref, bq_ref, wk_ref, bk_ref, wv_ref, bv_ref,
        wo_ref, bo_ref,
        ln1_g_ref, ln1_b_ref,
        w_ff1_ref, b_ff1_ref, w_ff2_ref, b_ff2_ref,
        ln2_g_ref, ln2_b_ref,
        w_fc_ref, b_fc_ref,
        out_ref):
    f32 = jnp.float32
    nhead, _, hd = wq_ref.shape
    scale = 1.0 / math.sqrt(hd)

    # fc_img + fc_text fused: block-diagonal weight, pre-concatenated input.
    # Result h == torch.cat((img_proj, text_proj), dim=1), already lane-dense [S, 128].
    h = jnp.dot(xy_ref[...], w_in_ref[...], preferred_element_type=f32) + b_in_ref[...]

    # --- nn.TransformerEncoderLayer (post-norm, ReLU FFN, eval mode) ---
    # Multi-head self-attention over the S(=batch) axis; per-head weight slices are
    # prepared in the wrapper, head outputs folded straight into the out_proj accumulator
    # (no activation concat / lane slicing in the kernel).
    attn = bo_ref[...].astype(f32)                                   # [1, d] -> broadcasts
    for hi in range(nhead):
        q = jnp.dot(h, wq_ref[hi], preferred_element_type=f32) + bq_ref[hi]   # [S, hd]
        k = jnp.dot(h, wk_ref[hi], preferred_element_type=f32) + bk_ref[hi]
        v = jnp.dot(h, wv_ref[hi], preferred_element_type=f32) + bv_ref[hi]
        s = lax.dot_general(q, k, (((1,), (1,)), ((), ())),
                            preferred_element_type=f32) * scale              # [S, S]
        s = s - jnp.max(s, axis=-1, keepdims=True)
        p = jnp.exp(s)
        p = p / jnp.sum(p, axis=-1, keepdims=True)
        ctx = jnp.dot(p, v, preferred_element_type=f32)                       # [S, hd]
        attn = attn + jnp.dot(ctx, wo_ref[hi], preferred_element_type=f32)    # [S, d]

    # TODO(synk): attention/FFN dropouts (p=0.1) and the final nn.Dropout(p=0.3) are
    # identity in eval mode; training-mode inverted-dropout via pltpu.prng_* not implemented.
    h1 = _layer_norm(h + attn, ln1_g_ref[...], ln1_b_ref[...])

    z = jnp.dot(h1, w_ff1_ref[...], preferred_element_type=f32) + b_ff1_ref[...]
    z = jnp.maximum(z, 0.0)
    ffn = jnp.dot(z, w_ff2_ref[...], preferred_element_type=f32) + b_ff2_ref[...]
    h2 = _layer_norm(h1 + ffn, ln2_g_ref[...], ln2_b_ref[...])

    # Final fc, lane-padded to 128 -> single unmasked lane-dense store.
    out = jnp.dot(h2, w_fc_ref[...], preferred_element_type=f32) + b_fc_ref[...]
    out_ref[...] = out.astype(out_ref.dtype)


def multimodal_transformer(img, text, p, *, nhead, lane_pad=128):
    """Eval-mode forward of MultiModalTransformer. Returns [B, output_size]."""
    B, d_img = img.shape
    _, d_text = text.shape
    hidden = p["w_img"].shape[1]
    d = 2 * hidden
    assert d % nhead == 0
    hd = d // nhead
    out_dim = p["w_fc"].shape[1]
    dtype = img.dtype

    # (1) Fuse fc_img / fc_text into one matmul: concatenated input + block-diag weight.
    xy = jnp.concatenate([img, text], axis=1)                         # [B, d_img+d_text]
    w_in = jnp.zeros((d_img + d_text, d), dtype)
    w_in = w_in.at[:d_img, :hidden].set(p["w_img"])
    w_in = w_in.at[d_img:, hidden:].set(p["w_text"])
    b_in = jnp.concatenate([p["b_img"], p["b_text"]], axis=1)         # [1, d]

    # (2) Per-head split of the attention projections (once, outside the kernel).
    def split_cols(w):        # [d, d] -> [nhead, d, hd]   (columns of head h)
        return w.reshape(d, nhead, hd).transpose(1, 0, 2)

    def split_bias(b):        # [1, d] -> [nhead, 1, hd]
        return b.reshape(nhead, 1, hd)

    wq, wk, wv = (split_cols(p[k]) for k in ("wq", "wk", "wv"))
    bq, bk, bv = (split_bias(p[k]) for k in ("bq", "bk", "bv"))
    wo = p["wo"].reshape(nhead, hd, d)                                # rows of head h
    bo = p["bo"]

    # (3) Lane-pad the tiny final projection (out_dim=3 -> 128); slice back afterwards.
    n_pad = max(lane_pad, out_dim)
    w_fc = jnp.zeros((d, n_pad), dtype).at[:, :out_dim].set(p["w_fc"])
    b_fc = jnp.zeros((1, n_pad), dtype).at[:, :out_dim].set(p["b_fc"])

    vmem = pl.BlockSpec(memory_space=pltpu.VMEM)
    out_pad = pl.pallas_call(
        multimodal_transformer_kernel,
        out_shape=jax.ShapeDtypeStruct((B, n_pad), dtype),
        in_specs=[vmem] * 21,
        out_specs=vmem,
    )(xy, w_in, b_in,
      wq, bq, wk, bk, wv, bv,
      wo, bo,
      p["ln1_g"], p["ln1_b"],
      p["w_ff1"], p["b_ff1"], p["w_ff2"], p["b_ff2"],
      p["ln2_g"], p["ln2_b"],
      w_fc, b_fc)
    return out_pad[:, :out_dim]


if __name__ == "__main__":
    # Small shapes consistent with the module: batch=8 (doubles as seq len),
    # img_dim=256, text_dim=128, hidden=64 (d_model=128), nhead=4, ffn=256, output=3.
    B, D_IMG, D_TEXT = 8, 256, 128
    HIDDEN, NHEAD, D_FF, OUT = 64, 4, 256, 3
    D_MODEL = 2 * HIDDEN

    keys = iter(jax.random.split(jax.random.PRNGKey(0), 32))

    def linear_init(fan_in, fan_out):
        bound = 1.0 / math.sqrt(fan_in)
        w = jax.random.uniform(next(keys), (fan_in, fan_out), jnp.float32, -bound, bound)
        b = jax.random.uniform(next(keys), (1, fan_out), jnp.float32, -bound, bound)
        return w, b

    img = jax.random.normal(next(keys), (B, D_IMG), jnp.float32)
    text = jax.random.normal(next(keys), (B, D_TEXT), jnp.float32)

    params = {}
    params["w_img"], params["b_img"] = linear_init(D_IMG, HIDDEN)
    params["w_text"], params["b_text"] = linear_init(D_TEXT, HIDDEN)
    params["wq"], params["bq"] = linear_init(D_MODEL, D_MODEL)
    params["wk"], params["bk"] = linear_init(D_MODEL, D_MODEL)
    params["wv"], params["bv"] = linear_init(D_MODEL, D_MODEL)
    params["wo"], params["bo"] = linear_init(D_MODEL, D_MODEL)
    params["w_ff1"], params["b_ff1"] = linear_init(D_MODEL, D_FF)
    params["w_ff2"], params["b_ff2"] = linear_init(D_FF, D_MODEL)
    params["w_fc"], params["b_fc"] = linear_init(D_MODEL, OUT)
    params["ln1_g"] = 1.0 + 0.1 * jax.random.uniform(next(keys), (1, D_MODEL), jnp.float32)
    params["ln1_b"] = 0.1 * jax.random.uniform(next(keys), (1, D_MODEL), jnp.float32)
    params["ln2_g"] = 1.0 + 0.1 * jax.random.uniform(next(keys), (1, D_MODEL), jnp.float32)
    params["ln2_b"] = 0.1 * jax.random.uniform(next(keys), (1, D_MODEL), jnp.float32)

    out = jax.block_until_ready(
        multimodal_transformer(img, text, params, nhead=NHEAD))

    # ----- pure-JAX reference (eval-mode forward of the PyTorch module) -----
    def reference(img, text, p):
        h = jnp.concatenate([img @ p["w_img"] + p["b_img"],
                             text @ p["w_text"] + p["b_text"]], axis=1)
        S = h.shape[0]
        hd = D_MODEL // NHEAD
        q = h @ p["wq"] + p["bq"]
        k = h @ p["wk"] + p["bk"]
        v = h @ p["wv"] + p["bv"]
        qh = q.reshape(S, NHEAD, hd).transpose(1, 0, 2)
        kh = k.reshape(S, NHEAD, hd).transpose(1, 0, 2)
        vh = v.reshape(S, NHEAD, hd).transpose(1, 0, 2)
        sc = jnp.einsum("hqd,hkd->hqk", qh, kh) / math.sqrt(hd)
        pr = jax.nn.softmax(sc, axis=-1)
        ctx = jnp.einsum("hqk,hkd->hqd", pr, vh).transpose(1, 0, 2).reshape(S, D_MODEL)
        attn = ctx @ p["wo"] + p["bo"]

        def ln(x, g, b):
            mu = x.mean(-1, keepdims=True)
            var = ((x - mu) ** 2).mean(-1, keepdims=True)
            return (x - mu) / jnp.sqrt(var + 1e-5) * g + b

        h1 = ln(h + attn, p["ln1_g"], p["ln1_b"])
        ffn = jnp.maximum(h1 @ p["w_ff1"] + p["b_ff1"], 0.0) @ p["w_ff2"] + p["b_ff2"]
        h2 = ln(h1 + ffn, p["ln2_g"], p["ln2_b"])
        return h2 @ p["w_fc"] + p["b_fc"]

    out_ref = reference(img, text, params)
    assert out.shape == (B, OUT), f"bad output shape {out.shape}"
    assert jnp.allclose(out, out_ref, atol=1e-4, rtol=1e-4), "output mismatch vs reference"

    print("KERNEL_OK")
</pallas_src>

<mosaic_0001>
module attributes {stable_mosaic.version = 11 : i64} {
  func.func @multimodal_transformer_kernel(%arg0: memref<8x384xf32, #tpu.memory_space<vmem>>, %arg1: memref<384x128xf32, #tpu.memory_space<vmem>>, %arg2: memref<1x128xf32, #tpu.memory_space<vmem>>, %arg3: memref<4x128x32xf32, #tpu.memory_space<vmem>>, %arg4: memref<4x1x32xf32, #tpu.memory_space<vmem>>, %arg5: memref<4x128x32xf32, #tpu.memory_space<vmem>>, %arg6: memref<4x1x32xf32, #tpu.memory_space<vmem>>, %arg7: memref<4x128x32xf32, #tpu.memory_space<vmem>>, %arg8: memref<4x1x32xf32, #tpu.memory_space<vmem>>, %arg9: memref<4x32x128xf32, #tpu.memory_space<vmem>>, %arg10: memref<1x128xf32, #tpu.memory_space<vmem>>, %arg11: memref<1x128xf32, #tpu.memory_space<vmem>>, %arg12: memref<1x128xf32, #tpu.memory_space<vmem>>, %arg13: memref<128x256xf32, #tpu.memory_space<vmem>>, %arg14: memref<1x256xf32, #tpu.memory_space<vmem>>, %arg15: memref<256x128xf32, #tpu.memory_space<vmem>>, %arg16: memref<1x128xf32, #tpu.memory_space<vmem>>, %arg17: memref<1x128xf32, #tpu.memory_space<vmem>>, %arg18: memref<1x128xf32, #tpu.memory_space<vmem>>, %arg19: memref<128x128xf32, #tpu.memory_space<vmem>>, %arg20: memref<1x128xf32, #tpu.memory_space<vmem>>, %arg21: memref<8x128xf32, #tpu.memory_space<vmem>>) attributes {dimension_semantics = [], scalar_prefetch = 0 : i64, scratch_operands = 0 : i64, tpu.core_type = #tpu.core_type<tc>} {
    %c0 = arith.constant 0 : index
    %c0_0 = arith.constant 0 : index
    %0 = vector.load %arg0[%c0, %c0_0] : memref<8x384xf32, #tpu.memory_space<vmem>>, vector<8x384xf32>
    %c0_1 = arith.constant 0 : index
    %c0_2 = arith.constant 0 : index
    %1 = vector.load %arg1[%c0_1, %c0_2] : memref<384x128xf32, #tpu.memory_space<vmem>>, vector<384x128xf32>
    %cst = arith.constant dense<0.000000e+00> : vector<8x128xf32>
    %2 = tpu.matmul %0, %1, %cst {dimension_numbers = #tpu.dot_dimension_numbers<[1], [0], [0], [1], [0, 0, 1, 1], [], []>} : vector<8x384xf32>, vector<384x128xf32>, vector<8x128xf32> -> vector<8x128xf32>
    %c0_3 = arith.constant 0 : index
    %c0_4 = arith.constant 0 : index
    %3 = vector.load %arg2[%c0_3, %c0_4] : memref<1x128xf32, #tpu.memory_space<vmem>>, vector<1x128xf32>
    %4 = vector.broadcast %3 : vector<1x128xf32> to vector<8x128xf32>
    %5 = arith.addf %2, %4 : vector<8x128xf32>
    %c0_5 = arith.constant 0 : index
    %c0_6 = arith.constant 0 : index
    %6 = vector.load %arg10[%c0_5, %c0_6] : memref<1x128xf32, #tpu.memory_space<vmem>>, vector<1x128xf32>
    %c0_7 = arith.constant 0 : index
    %c0_8 = arith.constant 0 : index
    %c0_9 = arith.constant 0 : index
    %7 = vector.load %arg3[%c0_7, %c0_8, %c0_9] : memref<4x128x32xf32, #tpu.memory_space<vmem>>, vector<1x128x32xf32>
    %8 = vector.shape_cast %7 : vector<1x128x32xf32> to vector<128x32xf32>
    %cst_10 = arith.constant dense<0.000000e+00> : vector<8x32xf32>
    %9 = tpu.matmul %5, %8, %cst_10 {dimension_numbers = #tpu.dot_dimension_numbers<[1], [0], [0], [1], [0, 0, 1, 1], [], []>} : vector<8x128xf32>, vector<128x32xf32>, vector<8x32xf32> -> vector<8x32xf32>
    %c0_11 = arith.constant 0 : index
    %c0_12 = arith.constant 0 : index
    %c0_13 = arith.constant 0 : index
    %10 = vector.load %arg4[%c0_11, %c0_12, %c0_13] : memref<4x1x32xf32, #tpu.memory_space<vmem>>, vector<1x1x32xf32>
    %11 = vector.shape_cast %10 : vector<1x1x32xf32> to vector<1x32xf32>
    %12 = vector.broadcast %11 : vector<1x32xf32> to vector<8x32xf32>
    %13 = arith.addf %9, %12 : vector<8x32xf32>
    %c0_14 = arith.constant 0 : index
    %c0_15 = arith.constant 0 : index
    %c0_16 = arith.constant 0 : index
    %14 = vector.load %arg5[%c0_14, %c0_15, %c0_16] : memref<4x128x32xf32, #tpu.memory_space<vmem>>, vector<1x128x32xf32>
    %15 = vector.shape_cast %14 : vector<1x128x32xf32> to vector<128x32xf32>
    %cst_17 = arith.constant dense<0.000000e+00> : vector<8x32xf32>
    %16 = tpu.matmul %5, %15, %cst_17 {dimension_numbers = #tpu.dot_dimension_numbers<[1], [0], [0], [1], [0, 0, 1, 1], [], []>} : vector<8x128xf32>, vector<128x32xf32>, vector<8x32xf32> -> vector<8x32xf32>
    %c0_18 = arith.constant 0 : index
    %c0_19 = arith.constant 0 : index
    %c0_20 = arith.constant 0 : index
    %17 = vector.load %arg6[%c0_18, %c0_19, %c0_20] : memref<4x1x32xf32, #tpu.memory_space<vmem>>, vector<1x1x32xf32>
    %18 = vector.shape_cast %17 : vector<1x1x32xf32> to vector<1x32xf32>
    %19 = vector.broadcast %18 : vector<1x32xf32> to vector<8x32xf32>
    %20 = arith.addf %16, %19 : vector<8x32xf32>
    %c0_21 = arith.constant 0 : index
    %c0_22 = arith.constant 0 : index
    %c0_23 = arith.constant 0 : index
    %21 = vector.load %arg7[%c0_21, %c0_22, %c0_23] : memref<4x128x32xf32, #tpu.memory_space<vmem>>, vector<1x128x32xf32>
    %22 = vector.shape_cast %21 : vector<1x128x32xf32> to vector<128x32xf32>
    %cst_24 = arith.constant dense<0.000000e+00> : vector<8x32xf32>
    %23 = tpu.matmul %5, %22, %cst_24 {dimension_numbers = #tpu.dot_dimension_numbers<[1], [0], [0], [1], [0, 0, 1, 1], [], []>} : vector<8x128xf32>, vector<128x32xf32>, vector<8x32xf32> -> vector<8x32xf32>
    %c0_25 = arith.constant 0 : index
    %c0_26 = arith.constant 0 : index
    %c0_27 = arith.constant 0 : index
    %24 = vector.load %arg8[%c0_25, %c0_26, %c0_27] : memref<4x1x32xf32, #tpu.memory_space<vmem>>, vector<1x1x32xf32>
    %25 = vector.shape_cast %24 : vector<1x1x32xf32> to vector<1x32xf32>
    %26 = vector.broadcast %25 : vector<1x32xf32> to vector<8x32xf32>
    %27 = arith.addf %23, %26 : vector<8x32xf32>
    %cst_28 = arith.constant dense<0.000000e+00> : vector<8x8xf32>
    %28 = tpu.matmul %13, %20, %cst_28 {dimension_numbers = #tpu.dot_dimension_numbers<[1], [1], [0], [0], [0, 0, 1, 0], [], []>} : vector<8x32xf32>, vector<8x32xf32>, vector<8x8xf32> -> vector<8x8xf32>
    %cst_29 = arith.constant 0.176776692 : f32
    %29 = vector.broadcast %cst_29 : f32 to vector<8x8xf32>
    %30 = arith.mulf %28, %29 : vector<8x8xf32>
    %cst_30 = arith.constant dense<0xFF800000> : vector<8xf32>
    %31 = vector.multi_reduction <maximumf>, %30, %cst_30 [1] : vector<8x8xf32> to vector<8xf32>
    %32 = vector.shape_cast %31 : vector<8xf32> to vector<8x1xf32>
    %33 = vector.broadcast %32 : vector<8x1xf32> to vector<8x8xf32>
    %34 = arith.subf %30, %33 : vector<8x8xf32>
    %35 = math.exp %34 : vector<8x8xf32>
    %cst_31 = arith.constant dense<0.000000e+00> : vector<8xf32>
    %36 = vector.multi_reduction <add>, %35, %cst_31 [1] : vector<8x8xf32> to vector<8xf32>
    %37 = vector.shape_cast %36 : vector<8xf32> to vector<8x1xf32>
    %38 = vector.broadcast %37 : vector<8x1xf32> to vector<8x8xf32>
    %39 = arith.divf %35, %38 : vector<8x8xf32>
    %cst_32 = arith.constant dense<0.000000e+00> : vector<8x32xf32>
    %40 = tpu.matmul %39, %27, %cst_32 {dimension_numbers = #tpu.dot_dimension_numbers<[1], [0], [0], [1], [0, 0, 1, 1], [], []>} : vector<8x8xf32>, vector<8x32xf32>, vector<8x32xf32> -> vector<8x32xf32>
    %c0_33 = arith.constant 0 : index
    %c0_34 = arith.constant 0 : index
    %c0_35 = arith.constant 0 : index
    %41 = vector.load %arg9[%c0_33, %c0_34, %c0_35] : memref<4x32x128xf32, #tpu.memory_space<vmem>>, vector<1x32x128xf32>
    %42 = vector.shape_cast %41 : vector<1x32x128xf32> to vector<32x128xf32>
    %cst_36 = arith.constant dense<0.000000e+00> : vector<8x128xf32>
    %43 = tpu.matmul %40, %42, %cst_36 {dimension_numbers = #tpu.dot_dimension_numbers<[1], [0], [0], [1], [0, 0, 1, 1], [], []>} : vector<8x32xf32>, vector<32x128xf32>, vector<8x128xf32> -> vector<8x128xf32>
    %44 = vector.broadcast %6 : vector<1x128xf32> to vector<8x128xf32>
    %45 = arith.addf %44, %43 : vector<8x128xf32>
    %c1 = arith.constant 1 : index
    %c0_37 = arith.constant 0 : index
    %c0_38 = arith.constant 0 : index
    %46 = vector.load %arg3[%c1, %c0_37, %c0_38] : memref<4x128x32xf32, #tpu.memory_space<vmem>>, vector<1x128x32xf32>
    %47 = vector.shape_cast %46 : vector<1x128x32xf32> to vector<128x32xf32>
    %cst_39 = arith.constant dense<0.000000e+00> : vector<8x32xf32>
    %48 = tpu.matmul %5, %47, %cst_39 {dimension_numbers = #tpu.dot_dimension_numbers<[1], [0], [0], [1], [0, 0, 1, 1], [], []>} : vector<8x128xf32>, vector<128x32xf32>, vector<8x32xf32> -> vector<8x32xf32>
    %c1_40 = arith.constant 1 : index
    %c0_41 = arith.constant 0 : index
    %c0_42 = arith.constant 0 : index
    %49 = vector.load %arg4[%c1_40, %c0_41, %c0_42] : memref<4x1x32xf32, #tpu.memory_space<vmem>>, vector<1x1x32xf32>
    %50 = vector.shape_cast %49 : vector<1x1x32xf32> to vector<1x32xf32>
    %51 = vector.broadcast %50 : vector<1x32xf32> to vector<8x32xf32>
    %52 = arith.addf %48, %51 : vector<8x32xf32>
    %c1_43 = arith.constant 1 : index
    %c0_44 = arith.constant 0 : index
    %c0_45 = arith.constant 0 : index
    %53 = vector.load %arg5[%c1_43, %c0_44, %c0_45] : memref<4x128x32xf32, #tpu.memory_space<vmem>>, vector<1x128x32xf32>
    %54 = vector.shape_cast %53 : vector<1x128x32xf32> to vector<128x32xf32>
    %cst_46 = arith.constant dense<0.000000e+00> : vector<8x32xf32>
    %55 = tpu.matmul %5, %54, %cst_46 {dimension_numbers = #tpu.dot_dimension_numbers<[1], [0], [0], [1], [0, 0, 1, 1], [], []>} : vector<8x128xf32>, vector<128x32xf32>, vector<8x32xf32> -> vector<8x32xf32>
    %c1_47 = arith.constant 1 : index
    %c0_48 = arith.constant 0 : index
    %c0_49 = arith.constant 0 : index
    %56 = vector.load %arg6[%c1_47, %c0_48, %c0_49] : memref<4x1x32xf32, #tpu.memory_space<vmem>>, vector<1x1x32xf32>
    %57 = vector.shape_cast %56 : vector<1x1x32xf32> to vector<1x32xf32>
    %58 = vector.broadcast %57 : vector<1x32xf32> to vector<8x32xf32>
    %59 = arith.addf %55, %58 : vector<8x32xf32>
    %c1_50 = arith.constant 1 : index
    %c0_51 = arith.constant 0 : index
    %c0_52 = arith.constant 0 : index
    %60 = vector.load %arg7[%c1_50, %c0_51, %c0_52] : memref<4x128x32xf32, #tpu.memory_space<vmem>>, vector<1x128x32xf32>
    %61 = vector.shape_cast %60 : vector<1x128x32xf32> to vector<128x32xf32>
    %cst_53 = arith.constant dense<0.000000e+00> : vector<8x32xf32>
    %62 = tpu.matmul %5, %61, %cst_53 {dimension_numbers = #tpu.dot_dimension_numbers<[1], [0], [0], [1], [0, 0, 1, 1], [], []>} : vector<8x128xf32>, vector<128x32xf32>, vector<8x32xf32> -> vector<8x32xf32>
    %c1_54 = arith.constant 1 : index
    %c0_55 = arith.constant 0 : index
    %c0_56 = arith.constant 0 : index
    %63 = vector.load %arg8[%c1_54, %c0_55, %c0_56] : memref<4x1x32xf32, #tpu.memory_space<vmem>>, vector<1x1x32xf32>
    %64 = vector.shape_cast %63 : vector<1x1x32xf32> to vector<1x32xf32>
    %65 = vector.broadcast %64 : vector<1x32xf32> to vector<8x32xf32>
    %66 = arith.addf %62, %65 : vector<8x32xf32>
    %cst_57 = arith.constant dense<0.000000e+00> : vector<8x8xf32>
    %67 = tpu.matmul %52, %59, %cst_57 {dimension_numbers = #tpu.dot_dimension_numbers<[1], [1], [0], [0], [0, 0, 1, 0], [], []>} : vector<8x32xf32>, vector<8x32xf32>, vector<8x8xf32> -> vector<8x8xf32>
    %cst_58 = arith.constant 0.176776692 : f32
    %68 = vector.broadcast %cst_58 : f32 to vector<8x8xf32>
    %69 = arith.mulf %67, %68 : vector<8x8xf32>
    %cst_59 = arith.constant dense<0xFF800000> : vector<8xf32>
    %70 = vector.multi_reduction <maximumf>, %69, %cst_59 [1] : vector<8x8xf32> to vector<8xf32>
    %71 = vector.shape_cast %70 : vector<8xf32> to vector<8x1xf32>
    %72 = vector.broadcast %71 : vector<8x1xf32> to vector<8x8xf32>
    %73 = arith.subf %69, %72 : vector<8x8xf32>
    %74 = math.exp %73 : vector<8x8xf32>
    %cst_60 = arith.constant dense<0.000000e+00> : vector<8xf32>
    %75 = vector.multi_reduction <add>, %74, %cst_60 [1] : vector<8x8xf32> to vector<8xf32>
    %76 = vector.shape_cast %75 : vector<8xf32> to vector<8x1xf32>
    %77 = vector.broadcast %76 : vector<8x1xf32> to vector<8x8xf32>
    %78 = arith.divf %74, %77 : vector<8x8xf32>
    %cst_61 = arith.constant dense<0.000000e+00> : vector<8x32xf32>
    %79 = tpu.matmul %78, %66, %cst_61 {dimension_numbers = #tpu.dot_dimension_numbers<[1], [0], [0], [1], [0, 0, 1, 1], [], []>} : vector<8x8xf32>, vector<8x32xf32>, vector<8x32xf32> -> vector<8x32xf32>
    %c1_62 = arith.constant 1 : index
    %c0_63 = arith.constant 0 : index
    %c0_64 = arith.constant 0 : index
    %80 = vector.load %arg9[%c1_62, %c0_63, %c0_64] : memref<4x32x128xf32, #tpu.memory_space<vmem>>, vector<1x32x128xf32>
    %81 = vector.shape_cast %80 : vector<1x32x128xf32> to vector<32x128xf32>
    %cst_65 = arith.constant dense<0.000000e+00> : vector<8x128xf32>
    %82 = tpu.matmul %79, %81, %cst_65 {dimension_numbers = #tpu.dot_dimension_numbers<[1], [0], [0], [1], [0, 0, 1, 1], [], []>} : vector<8x32xf32>, vector<32x128xf32>, vector<8x128xf32> -> vector<8x128xf32>
    %83 = arith.addf %45, %82 : vector<8x128xf32>
    %c2 = arith.constant 2 : index
    %c0_66 = arith.constant 0 : index
    %c0_67 = arith.constant 0 : index
    %84 = vector.load %arg3[%c2, %c0_66, %c0_67] : memref<4x128x32xf32, #tpu.memory_space<vmem>>, vector<1x128x32xf32>
    %85 = vector.shape_cast %84 : vector<1x128x32xf32> to vector<128x32xf32>
    %cst_68 = arith.constant dense<0.000000e+00> : vector<8x32xf32>
    %86 = tpu.matmul %5, %85, %cst_68 {dimension_numbers = #tpu.dot_dimension_numbers<[1], [0], [0], [1], [0, 0, 1, 1], [], []>} : vector<8x128xf32>, vector<128x32xf32>, vector<8x32xf32> -> vector<8x32xf32>
    %c2_69 = arith.constant 2 : index
    %c0_70 = arith.constant 0 : index
    %c0_71 = arith.constant 0 : index
    %87 = vector.load %arg4[%c2_69, %c0_70, %c0_71] : memref<4x1x32xf32, #tpu.memory_space<vmem>>, vector<1x1x32xf32>
    %88 = vector.shape_cast %87 : vector<1x1x32xf32> to vector<1x32xf32>
    %89 = vector.broadcast %88 : vector<1x32xf32> to vector<8x32xf32>
    %90 = arith.addf %86, %89 : vector<8x32xf32>
    %c2_72 = arith.constant 2 : index
    %c0_73 = arith.constant 0 : index
    %c0_74 = arith.constant 0 : index
    %91 = vector.load %arg5[%c2_72, %c0_73, %c0_74] : memref<4x128x32xf32, #tpu.memory_space<vmem>>, vector<1x128x32xf32>
    %92 = vector.shape_cast %91 : vector<1x128x32xf32> to vector<128x32xf32>
    %cst_75 = arith.constant dense<0.000000e+00> : vector<8x32xf32>
    %93 = tpu.matmul %5, %92, %cst_75 {dimension_numbers = #tpu.dot_dimension_numbers<[1], [0], [0], [1], [0, 0, 1, 1], [], []>} : vector<8x128xf32>, vector<128x32xf32>, vector<8x32xf32> -> vector<8x32xf32>
    %c2_76 = arith.constant 2 : index
    %c0_77 = arith.constant 0 : index
    %c0_78 = arith.constant 0 : index
    %94 = vector.load %arg6[%c2_76, %c0_77, %c0_78] : memref<4x1x32xf32, #tpu.memory_space<vmem>>, vector<1x1x32xf32>
    %95 = vector.shape_cast %94 : vector<1x1x32xf32> to vector<1x32xf32>
    %96 = vector.broadcast %95 : vector<1x32xf32> to vector<8x32xf32>
    %97 = arith.addf %93, %96 : vector<8x32xf32>
    %c2_79 = arith.constant 2 : index
    %c0_80 = arith.constant 0 : index
    %c0_81 = arith.constant 0 : index
    %98 = vector.load %arg7[%c2_79, %c0_80, %c0_81] : memref<4x128x32xf32, #tpu.memory_space<vmem>>, vector<1x128x32xf32>
    %99 = vector.shape_cast %98 : vector<1x128x32xf32> to vector<128x32xf32>
    %cst_82 = arith.constant dense<0.000000e+00> : vector<8x32xf32>
    %100 = tpu.matmul %5, %99, %cst_82 {dimension_numbers = #tpu.dot_dimension_numbers<[1], [0], [0], [1], [0, 0, 1, 1], [], []>} : vector<8x128xf32>, vector<128x32xf32>, vector<8x32xf32> -> vector<8x32xf32>
    %c2_83 = arith.constant 2 : index
    %c0_84 = arith.constant 0 : index
    %c0_85 = arith.constant 0 : index
    %101 = vector.load %arg8[%c2_83, %c0_84, %c0_85] : memref<4x1x32xf32, #tpu.memory_space<vmem>>, vector<1x1x32xf32>
    %102 = vector.shape_cast %101 : vector<1x1x32xf32> to vector<1x32xf32>
    %103 = vector.broadcast %102 : vector<1x32xf32> to vector<8x32xf32>
    %104 = arith.addf %100, %103 : vector<8x32xf32>
    %cst_86 = arith.constant dense<0.000000e+00> : vector<8x8xf32>
    %105 = tpu.matmul %90, %97, %cst_86 {dimension_numbers = #tpu.dot_dimension_numbers<[1], [1], [0], [0], [0, 0, 1, 0], [], []>} : vector<8x32xf32>, vector<8x32xf32>, vector<8x8xf32> -> vector<8x8xf32>
    %cst_87 = arith.constant 0.176776692 : f32
    %106 = vector.broadcast %cst_87 : f32 to vector<8x8xf32>
    %107 = arith.mulf %105, %106 : vector<8x8xf32>
    %cst_88 = arith.constant dense<0xFF800000> : vector<8xf32>
    %108 = vector.multi_reduction <maximumf>, %107, %cst_88 [1] : vector<8x8xf32> to vector<8xf32>
    %109 = vector.shape_cast %108 : vector<8xf32> to vector<8x1xf32>
    %110 = vector.broadcast %109 : vector<8x1xf32> to vector<8x8xf32>
    %111 = arith.subf %107, %110 : vector<8x8xf32>
    %112 = math.exp %111 : vector<8x8xf32>
    %cst_89 = arith.constant dense<0.000000e+00> : vector<8xf32>
    %113 = vector.multi_reduction <add>, %112, %cst_89 [1] : vector<8x8xf32> to vector<8xf32>
    %114 = vector.shape_cast %113 : vector<8xf32> to vector<8x1xf32>
    %115 = vector.broadcast %114 : vector<8x1xf32> to vector<8x8xf32>
    %116 = arith.divf %112, %115 : vector<8x8xf32>
    %cst_90 = arith.constant dense<0.000000e+00> : vector<8x32xf32>
    %117 = tpu.matmul %116, %104, %cst_90 {dimension_numbers = #tpu.dot_dimension_numbers<[1], [0], [0], [1], [0, 0, 1, 1], [], []>} : vector<8x8xf32>, vector<8x32xf32>, vector<8x32xf32> -> vector<8x32xf32>
    %c2_91 = arith.constant 2 : index
    %c0_92 = arith.constant 0 : index
    %c0_93 = arith.constant 0 : index
    %118 = vector.load %arg9[%c2_91, %c0_92, %c0_93] : memref<4x32x128xf32, #tpu.memory_space<vmem>>, vector<1x32x128xf32>
    %119 = vector.shape_cast %118 : vector<1x32x128xf32> to vector<32x128xf32>
    %cst_94 = arith.constant dense<0.000000e+00> : vector<8x128xf32>
    %120 = tpu.matmul %117, %119, %cst_94 {dimension_numbers = #tpu.dot_dimension_numbers<[1], [0], [0], [1], [0, 0, 1, 1], [], []>} : vector<8x32xf32>, vector<32x128xf32>, vector<8x128xf32> -> vector<8x128xf32>
    %121 = arith.addf %83, %120 : vector<8x128xf32>
    %c3 = arith.constant 3 : index
    %c0_95 = arith.constant 0 : index
    %c0_96 = arith.constant 0 : index
    %122 = vector.load %arg3[%c3, %c0_95, %c0_96] : memref<4x128x32xf32, #tpu.memory_space<vmem>>, vector<1x128x32xf32>
    %123 = vector.shape_cast %122 : vector<1x128x32xf32> to vector<128x32xf32>
    %cst_97 = arith.constant dense<0.000000e+00> : vector<8x32xf32>
    %124 = tpu.matmul %5, %123, %cst_97 {dimension_numbers = #tpu.dot_dimension_numbers<[1], [0], [0], [1], [0, 0, 1, 1], [], []>} : vector<8x128xf32>, vector<128x32xf32>, vector<8x32xf32> -> vector<8x32xf32>
    %c3_98 = arith.constant 3 : index
    %c0_99 = arith.constant 0 : index
    %c0_100 = arith.constant 0 : index
    %125 = vector.load %arg4[%c3_98, %c0_99, %c0_100] : memref<4x1x32xf32, #tpu.memory_space<vmem>>, vector<1x1x32xf32>
    %126 = vector.shape_cast %125 : vector<1x1x32xf32> to vector<1x32xf32>
    %127 = vector.broadcast %126 : vector<1x32xf32> to vector<8x32xf32>
    %128 = arith.addf %124, %127 : vector<8x32xf32>
    %c3_101 = arith.constant 3 : index
    %c0_102 = arith.constant 0 : index
    %c0_103 = arith.constant 0 : index
    %129 = vector.load %arg5[%c3_101, %c0_102, %c0_103] : memref<4x128x32xf32, #tpu.memory_space<vmem>>, vector<1x128x32xf32>
    %130 = vector.shape_cast %129 : vector<1x128x32xf32> to vector<128x32xf32>
    %cst_104 = arith.constant dense<0.000000e+00> : vector<8x32xf32>
    %131 = tpu.matmul %5, %130, %cst_104 {dimension_numbers = #tpu.dot_dimension_numbers<[1], [0], [0], [1], [0, 0, 1, 1], [], []>} : vector<8x128xf32>, vector<128x32xf32>, vector<8x32xf32> -> vector<8x32xf32>
    %c3_105 = arith.constant 3 : index
    %c0_106 = arith.constant 0 : index
    %c0_107 = arith.constant 0 : index
    %132 = vector.load %arg6[%c3_105, %c0_106, %c0_107] : memref<4x1x32xf32, #tpu.memory_space<vmem>>, vector<1x1x32xf32>
    %133 = vector.shape_cast %132 : vector<1x1x32xf32> to vector<1x32xf32>
    %134 = vector.broadcast %133 : vector<1x32xf32> to vector<8x32xf32>
    %135 = arith.addf %131, %134 : vector<8x32xf32>
    %c3_108 = arith.constant 3 : index
    %c0_109 = arith.constant 0 : index
    %c0_110 = arith.constant 0 : index
    %136 = vector.load %arg7[%c3_108, %c0_109, %c0_110] : memref<4x128x32xf32, #tpu.memory_space<vmem>>, vector<1x128x32xf32>
    %137 = vector.shape_cast %136 : vector<1x128x32xf32> to vector<128x32xf32>
    %cst_111 = arith.constant dense<0.000000e+00> : vector<8x32xf32>
    %138 = tpu.matmul %5, %137, %cst_111 {dimension_numbers = #tpu.dot_dimension_numbers<[1], [0], [0], [1], [0, 0, 1, 1], [], []>} : vector<8x128xf32>, vector<128x32xf32>, vector<8x32xf32> -> vector<8x32xf32>
    %c3_112 = arith.constant 3 : index
    %c0_113 = arith.constant 0 : index
    %c0_114 = arith.constant 0 : index
    %139 = vector.load %arg8[%c3_112, %c0_113, %c0_114] : memref<4x1x32xf32, #tpu.memory_space<vmem>>, vector<1x1x32xf32>
    %140 = vector.shape_cast %139 : vector<1x1x32xf32> to vector<1x32xf32>
    %141 = vector.broadcast %140 : vector<1x32xf32> to vector<8x32xf32>
    %142 = arith.addf %138, %141 : vector<8x32xf32>
    %cst_115 = arith.constant dense<0.000000e+00> : vector<8x8xf32>
    %143 = tpu.matmul %128, %135, %cst_115 {dimension_numbers = #tpu.dot_dimension_numbers<[1], [1], [0], [0], [0, 0, 1, 0], [], []>} : vector<8x32xf32>, vector<8x32xf32>, vector<8x8xf32> -> vector<8x8xf32>
    %cst_116 = arith.constant 0.176776692 : f32
    %144 = vector.broadcast %cst_116 : f32 to vector<8x8xf32>
    %145 = arith.mulf %143, %144 : vector<8x8xf32>
    %cst_117 = arith.constant dense<0xFF800000> : vector<8xf32>
    %146 = vector.multi_reduction <maximumf>, %145, %cst_117 [1] : vector<8x8xf32> to vector<8xf32>
    %147 = vector.shape_cast %146 : vector<8xf32> to vector<8x1xf32>
    %148 = vector.broadcast %147 : vector<8x1xf32> to vector<8x8xf32>
    %149 = arith.subf %145, %148 : vector<8x8xf32>
    %150 = math.exp %149 : vector<8x8xf32>
    %cst_118 = arith.constant dense<0.000000e+00> : vector<8xf32>
    %151 = vector.multi_reduction <add>, %150, %cst_118 [1] : vector<8x8xf32> to vector<8xf32>
    %152 = vector.shape_cast %151 : vector<8xf32> to vector<8x1xf32>
    %153 = vector.broadcast %152 : vector<8x1xf32> to vector<8x8xf32>
    %154 = arith.divf %150, %153 : vector<8x8xf32>
    %cst_119 = arith.constant dense<0.000000e+00> : vector<8x32xf32>
    %155 = tpu.matmul %154, %142, %cst_119 {dimension_numbers = #tpu.dot_dimension_numbers<[1], [0], [0], [1], [0, 0, 1, 1], [], []>} : vector<8x8xf32>, vector<8x32xf32>, vector<8x32xf32> -> vector<8x32xf32>
    %c3_120 = arith.constant 3 : index
    %c0_121 = arith.constant 0 : index
    %c0_122 = arith.constant 0 : index
    %156 = vector.load %arg9[%c3_120, %c0_121, %c0_122] : memref<4x32x128xf32, #tpu.memory_space<vmem>>, vector<1x32x128xf32>
    %157 = vector.shape_cast %156 : vector<1x32x128xf32> to vector<32x128xf32>
    %cst_123 = arith.constant dense<0.000000e+00> : vector<8x128xf32>
    %158 = tpu.matmul %155, %157, %cst_123 {dimension_numbers = #tpu.dot_dimension_numbers<[1], [0], [0], [1], [0, 0, 1, 1], [], []>} : vector<8x32xf32>, vector<32x128xf32>, vector<8x128xf32> -> vector<8x128xf32>
    %159 = arith.addf %121, %158 : vector<8x128xf32>
    %160 = arith.addf %5, %159 : vector<8x128xf32>
    %c0_124 = arith.constant 0 : index
    %c0_125 = arith.constant 0 : index
    %161 = vector.load %arg11[%c0_124, %c0_125] : memref<1x128xf32, #tpu.memory_space<vmem>>, vector<1x128xf32>
    %c0_126 = arith.constant 0 : index
    %c0_127 = arith.constant 0 : index
    %162 = vector.load %arg12[%c0_126, %c0_127] : memref<1x128xf32, #tpu.memory_space<vmem>>, vector<1x128xf32>
    %cst_128 = arith.constant dense<0.000000e+00> : vector<8xf32>
    %163 = vector.multi_reduction <add>, %160, %cst_128 [1] : vector<8x128xf32> to vector<8xf32>
    %164 = vector.shape_cast %163 : vector<8xf32> to vector<8x1xf32>
    %cst_129 = arith.constant 1.280000e+02 : f32
    %165 = vector.broadcast %cst_129 : f32 to vector<8x1xf32>
    %166 = arith.divf %164, %165 : vector<8x1xf32>
    %167 = vector.broadcast %166 : vector<8x1xf32> to vector<8x128xf32>
    %168 = arith.subf %160, %167 : vector<8x128xf32>
    %169 = arith.mulf %168, %168 : vector<8x128xf32>
    %cst_130 = arith.constant dense<0.000000e+00> : vector<8xf32>
    %170 = vector.multi_reduction <add>, %169, %cst_130 [1] : vector<8x128xf32> to vector<8xf32>
    %171 = vector.shape_cast %170 : vector<8xf32> to vector<8x1xf32>
    %cst_131 = arith.constant 1.280000e+02 : f32
    %172 = vector.broadcast %cst_131 : f32 to vector<8x1xf32>
    %173 = arith.divf %171, %172 : vector<8x1xf32>
    %cst_132 = arith.constant 9.99999974E-6 : f32
    %174 = vector.broadcast %cst_132 : f32 to vector<8x1xf32>
    %175 = arith.addf %173, %174 : vector<8x1xf32>
    %176 = math.rsqrt %175 : vector<8x1xf32>
    %177 = vector.broadcast %176 : vector<8x1xf32> to vector<8x128xf32>
    %178 = arith.mulf %168, %177 : vector<8x128xf32>
    %179 = vector.broadcast %161 : vector<1x128xf32> to vector<8x128xf32>
    %180 = arith.mulf %178, %179 : vector<8x128xf32>
    %181 = vector.broadcast %162 : vector<1x128xf32> to vector<8x128xf32>
    %182 = arith.addf %180, %181 : vector<8x128xf32>
    %c0_133 = arith.constant 0 : index
    %c0_134 = arith.constant 0 : index
    %183 = vector.load %arg13[%c0_133, %c0_134] : memref<128x256xf32, #tpu.memory_space<vmem>>, vector<128x256xf32>
    %cst_135 = arith.constant dense<0.000000e+00> : vector<8x256xf32>
    %184 = tpu.matmul %182, %183, %cst_135 {dimension_numbers = #tpu.dot_dimension_numbers<[1], [0], [0], [1], [0, 0, 1, 1], [], []>} : vector<8x128xf32>, vector<128x256xf32>, vector<8x256xf32> -> vector<8x256xf32>
    %c0_136 = arith.constant 0 : index
    %c0_137 = arith.constant 0 : index
    %185 = vector.load %arg14[%c0_136, %c0_137] : memref<1x256xf32, #tpu.memory_space<vmem>>, vector<1x256xf32>
    %186 = vector.broadcast %185 : vector<1x256xf32> to vector<8x256xf32>
    %187 = arith.addf %184, %186 : vector<8x256xf32>
    %cst_138 = arith.constant 0.000000e+00 : f32
    %188 = vector.broadcast %cst_138 : f32 to vector<8x256xf32>
    %189 = arith.maximumf %187, %188 : vector<8x256xf32>
    %c0_139 = arith.constant 0 : index
    %c0_140 = arith.constant 0 : index
    %190 = vector.load %arg15[%c0_139, %c0_140] : memref<256x128xf32, #tpu.memory_space<vmem>>, vector<256x128xf32>
    %cst_141 = arith.constant dense<0.000000e+00> : vector<8x128xf32>
    %191 = tpu.matmul %189, %190, %cst_141 {dimension_numbers = #tpu.dot_dimension_numbers<[1], [0], [0], [1], [0, 0, 1, 1], [], []>} : vector<8x256xf32>, vector<256x128xf32>, vector<8x128xf32> -> vector<8x128xf32>
    %c0_142 = arith.constant 0 : index
    %c0_143 = arith.constant 0 : index
    %192 = vector.load %arg16[%c0_142, %c0_143] : memref<1x128xf32, #tpu.memory_space<vmem>>, vector<1x128xf32>
    %193 = vector.broadcast %192 : vector<1x128xf32> to vector<8x128xf32>
    %194 = arith.addf %191, %193 : vector<8x128xf32>
    %195 = arith.addf %182, %194 : vector<8x128xf32>
    %c0_144 = arith.constant 0 : index
    %c0_145 = arith.constant 0 : index
    %196 = vector.load %arg17[%c0_144, %c0_145] : memref<1x128xf32, #tpu.memory_space<vmem>>, vector<1x128xf32>
    %c0_146 = arith.constant 0 : index
    %c0_147 = arith.constant 0 : index
    %197 = vector.load %arg18[%c0_146, %c0_147] : memref<1x128xf32, #tpu.memory_space<vmem>>, vector<1x128xf32>
    %cst_148 = arith.constant dense<0.000000e+00> : vector<8xf32>
    %198 = vector.multi_reduction <add>, %195, %cst_148 [1] : vector<8x128xf32> to vector<8xf32>
    %199 = vector.shape_cast %198 : vector<8xf32> to vector<8x1xf32>
    %cst_149 = arith.constant 1.280000e+02 : f32
    %200 = vector.broadcast %cst_149 : f32 to vector<8x1xf32>
    %201 = arith.divf %199, %200 : vector<8x1xf32>
    %202 = vector.broadcast %201 : vector<8x1xf32> to vector<8x128xf32>
    %203 = arith.subf %195, %202 : vector<8x128xf32>
    %204 = arith.mulf %203, %203 : vector<8x128xf32>
    %cst_150 = arith.constant dense<0.000000e+00> : vector<8xf32>
    %205 = vector.multi_reduction <add>, %204, %cst_150 [1] : vector<8x128xf32> to vector<8xf32>
    %206 = vector.shape_cast %205 : vector<8xf32> to vector<8x1xf32>
    %cst_151 = arith.constant 1.280000e+02 : f32
    %207 = vector.broadcast %cst_151 : f32 to vector<8x1xf32>
    %208 = arith.divf %206, %207 : vector<8x1xf32>
    %cst_152 = arith.constant 9.99999974E-6 : f32
    %209 = vector.broadcast %cst_152 : f32 to vector<8x1xf32>
    %210 = arith.addf %208, %209 : vector<8x1xf32>
    %211 = math.rsqrt %210 : vector<8x1xf32>
    %212 = vector.broadcast %211 : vector<8x1xf32> to vector<8x128xf32>
    %213 = arith.mulf %203, %212 : vector<8x128xf32>
    %214 = vector.broadcast %196 : vector<1x128xf32> to vector<8x128xf32>
    %215 = arith.mulf %213, %214 : vector<8x128xf32>
    %216 = vector.broadcast %197 : vector<1x128xf32> to vector<8x128xf32>
    %217 = arith.addf %215, %216 : vector<8x128xf32>
    %c0_153 = arith.constant 0 : index
    %c0_154 = arith.constant 0 : index
    %218 = vector.load %arg19[%c0_153, %c0_154] : memref<128x128xf32, #tpu.memory_space<vmem>>, vector<128x128xf32>
    %cst_155 = arith.constant dense<0.000000e+00> : vector<8x128xf32>
    %219 = tpu.matmul %217, %218, %cst_155 {dimension_numbers = #tpu.dot_dimension_numbers<[1], [0], [0], [1], [0, 0, 1, 1], [], []>} : vector<8x128xf32>, vector<128x128xf32>, vector<8x128xf32> -> vector<8x128xf32>
    %c0_156 = arith.constant 0 : index
    %c0_157 = arith.constant 0 : index
    %220 = vector.load %arg20[%c0_156, %c0_157] : memref<1x128xf32, #tpu.memory_space<vmem>>, vector<1x128xf32>
    %221 = vector.broadcast %220 : vector<1x128xf32> to vector<8x128xf32>
    %222 = arith.addf %219, %221 : vector<8x128xf32>
    %c0_158 = arith.constant 0 : index
    %c0_159 = arith.constant 0 : index
    %223 = vector.load %arg21[%c0_158, %c0_159] : memref<8x128xf32, #tpu.memory_space<vmem>>, vector<8x128xf32>
    tpu.vector_store %arg21[%c0_158, %c0_159], %222 {strides = array<i32>} : memref<8x128xf32, #tpu.memory_space<vmem>>, vector<8x128xf32>,
    return
  }
}

</mosaic_0001>

<bundles_post_ra>
// kernel: tpu_custom_call.1
= control target key start
LH: loop header
LB: loop body
LE: loop exit
PB: predicated region body
PF: predicated region fallthrough
CT: control target
= control target key end

     0   :  { %s5471_s0 = inlined_call_operand.vmem [shape: f32[8,384], index: 0, kind: input, shape index: {}]   ;;  %s5472_s1 = inlined_call_operand.vmem [shape: f32[384,128], index: 1, kind: input, shape index: {}]   ;;  %s5473_s2 = inlined_call_operand.vmem [shape: f32[1,128], index: 2, kind: input, shape index: {}]   ;;  %s5474_s3 = inlined_call_operand.vmem [shape: f32[4,128,32], index: 3, kind: input, shape index: {}]   ;;  %s5475_s4 = inlined_call_operand.vmem [shape: f32[4,1,32], index: 4, kind: input, shape index: {}]   ;;  %s5476_s5 = inlined_call_operand.vmem [shape: f32[4,128,32], index: 5, kind: input, shape index: {}]   ;;  %s5477_s6 = inlined_call_operand.vmem [shape: f32[4,1,32], index: 6, kind: input, shape index: {}]   ;;  %s5478_s7 = inlined_call_operand.vmem [shape: f32[4,128,32], index: 7, kind: input, shape index: {}]   ;;  %s5479_s8 = inlined_call_operand.vmem [shape: f32[4,1,32], index: 8, kind: input, shape index: {}]   ;;  %s5480_s9 = inlined_call_operand.vmem [shape: f32[4,32,128], index: 9, kind: input, shape index: {}]   ;;  %s5481_s10 = inlined_call_operand.vmem [shape: f32[1,128], index: 10, kind: input, shape index: {}]   ;;  %s5482_s11 = inlined_call_operand.vmem [shape: f32[1,128], index: 11, kind: input, shape index: {}]   ;;  %s5483_s12 = inlined_call_operand.vmem [shape: f32[1,128], index: 12, kind: input, shape index: {}]   ;;  %s5484_s13 = inlined_call_operand.vmem [shape: f32[128,256], index: 13, kind: input, shape index: {}]   ;;  %s5485_s14 = inlined_call_operand.vmem [shape: f32[1,256], index: 14, kind: input, shape index: {}]   ;;  %s5486_s15 = inlined_call_operand.vmem [shape: f32[256,128], index: 15, kind: input, shape index: {}]   ;;  %s5487_s16 = inlined_call_operand.vmem [shape: f32[1,128], index: 16, kind: input, shape index: {}]   ;;  %s5488_s17 = inlined_call_operand.vmem [shape: f32[1,128], index: 17, kind: input, shape index: {}]   ;;  %s5489_s18 = inlined_call_operand.vmem [shape: f32[1,128], index: 18, kind: input, shape index: {}]   ;;  %s5490_s19 = inlined_call_operand.vmem [shape: f32[128,128], index: 19, kind: input, shape index: {}]   ;;  %s5491_s20 = inlined_call_operand.vmem [shape: f32[1,128], index: 20, kind: input, shape index: {}]   ;;  %s5492_s21 = inlined_call_operand.hbm [shape: f32[8,128], index: 21, kind: output, shape index: {}]  }
   0x1   :  { %5498 = sst [smem:[#allocation5_spill]] %s5471_s0 }
   0x2   :  { %5499 = sst [smem:[#allocation6_spill]] %s5472_s1 }
   0x3   :  { %5500 = sst [smem:[#allocation7_spill]] %s5473_s2 }
   0x4   :  { %5501 = sst [smem:[#allocation8_spill]] %s5474_s3 }
   0x5   :  { %5502 = sst [smem:[#allocation9_spill]] %s5475_s4 }
   0x6   :  { %5503 = sst [smem:[#allocation10_spill]] %s5476_s5 }
   0x7   :  { %s5504_s26 = sld [smem:[#allocation6_spill]]  ;;  %v3924_v4 = vmov 0.0   ;;  %vm3925_vm0 = vmmov 0  }
   0x8   :  { %3305 = vmatprep.subr.mxu1 %v3924_v4  ;;  %3337 = vmatprep.mubr.msk.f32.mxu1 %vm3925_vm0, %v3924_v4 }
   0xd   :  { %v103_v0 = vld [vmem:[%s5504_s26 + $0xf8] sm:$0xff]  ;;  %v102_v2 = vld [vmem:[%s5504_s26 + $0xf0] sm:$0xff]  ;;  %v101_v5 = vld [vmem:[%s5504_s26 + $0xe8] sm:$0xff] }
   0xe   :  { %v87_v1 = vld [vmem:[%s5504_s26 + $0x78] sm:$0xff]  ;;  %2961 = vmatprep.subr.mxu0 %v103_v0  ;;  %v86_v3 = vld [vmem:[%s5504_s26 + $0x70] sm:$0xff]  ;;  %v85_v7 = vld [vmem:[%s5504_s26 + $0x68] sm:$0xff] }
   0xf   :  { %2962 = vmatpush3.msra.mxu0 %v87_v1  ;;  %v119_v6 = vld [vmem:[%s5504_s26 + $0x178] sm:$0xff]  ;;  %v118_v8 = vld [vmem:[%s5504_s26 + $0x170] sm:$0xff]  ;;  %v100_v9 = vld [vmem:[%s5504_s26 + $0xe0] sm:$0xff] }
  0x10   :  { %2963 = vmatprep.subr.mxu0 %v102_v2  ;;  %3306 = vmatpush3.msra.mxu1 %v119_v6  ;;  %v117_v10 = vld [vmem:[%s5504_s26 + $0x168] sm:$0xff]  ;;  %v84_v11 = vld [vmem:[%s5504_s26 + $0x60] sm:$0xff]  ;;  %v99_v12 = vld [vmem:[%s5504_s26 + $0xd8] sm:$0xff] }
  0x11   :  { %2964 = vmatpush3.msra.mxu0 %v86_v3  ;;  %3307 = vmatprep.subr.mxu1 %v3924_v4  ;;  %v116_v13 = vld [vmem:[%s5504_s26 + $0x160] sm:$0xff]  ;;  %v83_v14 = vld [vmem:[%s5504_s26 + $0x58] sm:$0xff]  ;;  %v98_v15 = vld [vmem:[%s5504_s26 + $0xd0] sm:$0xff] }
  0x12   :  { %2965 = vmatprep.subr.mxu0 %v101_v5  ;;  %3308 = vmatpush3.msra.mxu1 %v118_v8  ;;  %v115_v16 = vld [vmem:[%s5504_s26 + $0x158] sm:$0xff]  ;;  %v82_v17 = vld [vmem:[%s5504_s26 + $0x50] sm:$0xff]  ;;  %v97_v18 = vld [vmem:[%s5504_s26 + $0xc8] sm:$0xff] }
  0x13   :  { %2966 = vmatpush3.msra.mxu0 %v85_v7  ;;  %3309 = vmatprep.subr.mxu1 %v3924_v4  ;;  %v114_v19 = vld [vmem:[%s5504_s26 + $0x150] sm:$0xff]  ;;  %v81_v20 = vld [vmem:[%s5504_s26 + $0x48] sm:$0xff]  ;;  %v96_v21 = vld [vmem:[%s5504_s26 + $0xc0] sm:$0xff] }
  0x14   :  { %2967 = vmatprep.subr.mxu0 %v100_v9  ;;  %3310 = vmatpush3.msra.mxu1 %v117_v10  ;;  %v113_v22 = vld [vmem:[%s5504_s26 + $0x148] sm:$0xff]  ;;  %v80_v23 = vld [vmem:[%s5504_s26 + $0x40] sm:$0xff]  ;;  %v95_v24 = vld [vmem:[%s5504_s26 + $0xb8] sm:$0xff] }
  0x15   :  { %2968 = vmatpush3.msra.mxu0 %v84_v11  ;;  %3311 = vmatprep.subr.mxu1 %v3924_v4  ;;  %v112_v25 = vld [vmem:[%s5504_s26 + $0x140] sm:$0xff]  ;;  %v79_v26 = vld [vmem:[%s5504_s26 + $0x38] sm:$0xff]  ;;  %v94_v27 = vld [vmem:[%s5504_s26 + $0xb0] sm:$0xff] }
  0x16   :  { %2969 = vmatprep.subr.mxu0 %v99_v12  ;;  %3312 = vmatpush3.msra.mxu1 %v116_v13  ;;  %v111_v28 = vld [vmem:[%s5504_s26 + $0x138] sm:$0xff]  ;;  %v78_v29 = vld [vmem:[%s5504_s26 + $0x30] sm:$0xff]  ;;  %v93_v30 = vld [vmem:[%s5504_s26 + $0xa8] sm:$0xff] }
  0x17   :  { %2970 = vmatpush3.msra.mxu0 %v83_v14  ;;  %3313 = vmatprep.subr.mxu1 %v3924_v4  ;;  %v110_v31 = vld [vmem:[%s5504_s26 + $0x130] sm:$0xff]  ;;  %v77_v32 = vld [vmem:[%s5504_s26 + $0x28] sm:$0xff]  ;;  %v92_v33 = vld [vmem:[%s5504_s26 + $0xa0] sm:$0xff] }
  0x18   :  { %2971 = vmatprep.subr.mxu0 %v98_v15  ;;  %3314 = vmatpush3.msra.mxu1 %v115_v16  ;;  %v109_v34 = vld [vmem:[%s5504_s26 + $0x128] sm:$0xff]  ;;  %v76_v35 = vld [vmem:[%s5504_s26 + $0x20] sm:$0xff]  ;;  %v91_v36 = vld [vmem:[%s5504_s26 + $0x98] sm:$0xff] }
  0x19   :  { %2972 = vmatpush3.msra.mxu0 %v82_v17  ;;  %3315 = vmatprep.subr.mxu1 %v3924_v4  ;;  %v108_v37 = vld [vmem:[%s5504_s26 + $0x120] sm:$0xff]  ;;  %v75_v38 = vld [vmem:[%s5504_s26 + $0x18] sm:$0xff]  ;;  %v90_v39 = vld [vmem:[%s5504_s26 + $0x90] sm:$0xff] }
  0x1a   :  { %2973 = vmatprep.subr.mxu0 %v97_v18  ;;  %3316 = vmatpush3.msra.mxu1 %v114_v19  ;;  %v107_v40 = vld [vmem:[%s5504_s26 + $0x118] sm:$0xff] }
  0x1b   :  { %2974 = vmatpush3.msra.mxu0 %v81_v20  ;;  %3317 = vmatprep.subr.mxu1 %v3924_v4 }
  0x1c   :  { %2975 = vmatprep.subr.mxu0 %v96_v21  ;;  %3318 = vmatpush3.msra.mxu1 %v113_v22 }
  0x1d   :  { %2976 = vmatpush3.msra.mxu0 %v80_v23  ;;  %3319 = vmatprep.subr.mxu1 %v3924_v4 }
  0x1e   :  { %2977 = vmatprep.subr.mxu0 %v95_v24  ;;  %3320 = vmatpush3.msra.mxu1 %v112_v25 }
  0x1f   :  { %2978 = vmatpush3.msra.mxu0 %v79_v26  ;;  %3321 = vmatprep.subr.mxu1 %v3924_v4 }
  0x20   :  { %2979 = vmatprep.subr.mxu0 %v94_v27  ;;  %3322 = vmatpush3.msra.mxu1 %v111_v28 }
  0x21   :  { %2980 = vmatpush3.msra.mxu0 %v78_v29  ;;  %3323 = vmatprep.subr.mxu1 %v3924_v4 }
  0x22   :  { %2981 = vmatprep.subr.mxu0 %v93_v30  ;;  %3324 = vmatpush3.msra.mxu1 %v110_v31 }
  0x23   :  { %2982 = vmatpush3.msra.mxu0 %v77_v32  ;;  %3325 = vmatprep.subr.mxu1 %v3924_v4 }
  0x24   :  { %2983 = vmatprep.subr.mxu0 %v92_v33  ;;  %3326 = vmatpush3.msra.mxu1 %v109_v34 }
  0x25   :  { %2984 = vmatpush3.msra.mxu0 %v76_v35  ;;  %3327 = vmatprep.subr.mxu1 %v3924_v4 }
  0x26   :  { %26 = vsyncpa [#allocation3], 0  ;;  %2985 = vmatprep.subr.mxu0 %v91_v36  ;;  %v74_v41 = vld [vmem:[%s5504_s26 + $0x10] sm:$0xff]  ;;  %3328 = vmatpush3.msra.mxu1 %v108_v37  ;;  %v89_v42 = vld [vmem:[%s5504_s26 + $0x88] sm:$0xff]  ;;  %s5505_s27 = sld [smem:[#allocation5_spill]]  ;;  %vm547_vm1 = vcmask 261120  }
  0x27   :  { %2986 = vmatpush3.msra.mxu0 %v75_v38  ;;  %3329 = vmatprep.subr.mxu1 %v3924_v4  ;;  %v73_v44 = vld [vmem:[%s5504_s26 + $0x8] sm:$0xff]  ;;  %v106_v45 = vld [vmem:[%s5504_s26 + $0x110] sm:$0xff]  ;;  %v88_v46 = vld [vmem:[%s5504_s26 + $0x80] sm:$0xff]  ;;  %s5506_s30 = sld [smem:[#allocation8_spill]]  ;;  %vm625_vm2 = vcmask 64512  }
  0x28   :  { %2987 = vmatprep.subr.mxu0 %v90_v39  ;;  %3330 = vmatpush3.msra.mxu1 %v107_v40  ;;  %v72_v47 = vld [vmem:[%s5504_s26] sm:$0xff]  ;;  %v105_v48 = vld [vmem:[%s5504_s26 + $0x108] sm:$0xff]  ;;  %s5507_s23 = sld [smem:[#allocation10_spill]]  ;;  %v469_v29 = vld [vmem:[%s5478_s7 + $0x78] sm:$0xff] }
  0x29   :  { %2988 = vmatpush3.msra.mxu0 %v74_v41  ;;  %3331 = vmatprep.subr.mxu1 %v3924_v4  ;;  %v104_v50 = vld [vmem:[%s5504_s26 + $0x100] sm:$0xff]  ;;  %s5508_s4 = sld [smem:[#allocation7_spill]]  ;;  %v468_v30 = vld [vmem:[%s5478_s7 + $0x70] sm:$0xff]  ;;  %v467_v31 = vld [vmem:[%s5478_s7 + $0x68] sm:$0xff] }
  0x2a   :  { %2989 = vmatprep.subr.mxu0 %v89_v42  ;;  %3332 = vmatpush3.msra.mxu1 %v106_v45  ;;  %v466_v32 = vld [vmem:[%s5478_s7 + $0x60] sm:$0xff]  ;;  %v465_v33 = vld [vmem:[%s5478_s7 + $0x58] sm:$0xff]  ;;  %v464_v34 = vld [vmem:[%s5478_s7 + $0x50] sm:$0xff]  ;;  %s5509_s1 = sld [smem:[#allocation9_spill]] }
  0x2b   :  { %2990 = vmatpush3.msra.mxu0 %v73_v44  ;;  %3333 = vmatprep.subr.mxu1 %v3924_v4  ;;  %v463_v35 = vld [vmem:[%s5478_s7 + $0x48] sm:$0xff]  ;;  %v462_v36 = vld [vmem:[%s5478_s7 + $0x40] sm:$0xff]  ;;  %v461_v37 = vld [vmem:[%s5478_s7 + $0x38] sm:$0xff] }
  0x2c   :  { %v70_v43 = vld [vmem:[%s5505_s27 + $0x8] sm:$0xff]  ;;  %v69_v49 = vld [vmem:[%s5505_s27] sm:$0xff]  ;;  %2991 = vmatprep.subr.mxu0 %v88_v46  ;;  %3334 = vmatpush3.msra.mxu1 %v105_v48  ;;  %v71_v51 = vld [vmem:[%s5505_s27 + $0x10] sm:$0xff] }
  0x2d   :  { %191 = vmatprep.mubr.f32.mxu0 %v70_v43  ;;  %2992 = vmatpush3.msra.mxu0 %v72_v47  ;;  %v283_v52 = vld [vmem:[%s5506_s30 + $0x78] sm:$0xff]  ;;  %v282_v54 = vld [vmem:[%s5506_s30 + $0x70] sm:$0xff]  ;;  %v281_v56 = vld [vmem:[%s5506_s30 + $0x68] sm:$0xff] }
  0x2e   :  { %192 = vmatmul.mubr.f32.vlgmr.msra.gmra.mxu0 %v69_v49  ;;  %3335 = vmatprep.subr.mxu1 %v3924_v4  ;;  %v376_v53 = vld [vmem:[%s5507_s23 + $0x78] sm:$0xff]  ;;  %v375_v55 = vld [vmem:[%s5507_s23 + $0x70] sm:$0xff]  ;;  %v374_v57 = vld [vmem:[%s5507_s23 + $0x68] sm:$0xff] }
  0x2f   :  { %3336 = vmatpush3.msra.mxu1 %v104_v50  ;;  %3340 = vmatprep.subr.mxu0 %v3924_v4  ;;  %v280_v58 = vld [vmem:[%s5506_s30 + $0x60] sm:$0xff]  ;;  %v279_v60 = vld [vmem:[%s5506_s30 + $0x58] sm:$0xff]  ;;  %v278_v62 = vld [vmem:[%s5506_s30 + $0x50] sm:$0xff] }
  0x30   :  { %3338 = vmatmul.mubr.f32.vlgmr.msra.gmra.mxu1 %v71_v51  ;;  %3341 = vmatpush3.msra.mxu0 %v283_v52  ;;  %v373_v59 = vld [vmem:[%s5507_s23 + $0x60] sm:$0xff]  ;;  %v372_v61 = vld [vmem:[%s5507_s23 + $0x58] sm:$0xff]  ;;  %v371_v63 = vld [vmem:[%s5507_s23 + $0x50] sm:$0xff] }
  0x31   :  { %3375 = vmatprep.subr.mxu1 %v3924_v4  ;;  %3342 = vmatprep.subr.mxu0 %v3924_v4  ;;  %v277_v0 = vld [vmem:[%s5506_s30 + $0x48] sm:$0xff]  ;;  %v276_v2 = vld [vmem:[%s5506_s30 + $0x40] sm:$0xff]  ;;  %v275_v5 = vld [vmem:[%s5506_s30 + $0x38] sm:$0xff] }
  0x32   :  { %3376 = vmatpush3.msra.mxu1 %v376_v53  ;;  %3343 = vmatpush3.msra.mxu0 %v282_v54  ;;  %v370_v1 = vld [vmem:[%s5507_s23 + $0x48] sm:$0xff]  ;;  %v369_v3 = vld [vmem:[%s5507_s23 + $0x40] sm:$0xff]  ;;  %v368_v6 = vld [vmem:[%s5507_s23 + $0x38] sm:$0xff] }
  0x33   :  { %3377 = vmatprep.subr.mxu1 %v3924_v4  ;;  %3344 = vmatprep.subr.mxu0 %v3924_v4  ;;  %v274_v7 = vld [vmem:[%s5506_s30 + $0x30] sm:$0xff]  ;;  %v273_v9 = vld [vmem:[%s5506_s30 + $0x28] sm:$0xff]  ;;  %v272_v11 = vld [vmem:[%s5506_s30 + $0x20] sm:$0xff] }
  0x34   :  { %3378 = vmatpush3.msra.mxu1 %v375_v55  ;;  %3345 = vmatpush3.msra.mxu0 %v281_v56  ;;  %v367_v8 = vld [vmem:[%s5507_s23 + $0x30] sm:$0xff]  ;;  %v366_v10 = vld [vmem:[%s5507_s23 + $0x28] sm:$0xff]  ;;  %v365_v12 = vld [vmem:[%s5507_s23 + $0x20] sm:$0xff] }
  0x35   :  { %3379 = vmatprep.subr.mxu1 %v3924_v4  ;;  %3346 = vmatprep.subr.mxu0 %v3924_v4  ;;  %v271_v13 = vld [vmem:[%s5506_s30 + $0x18] sm:$0xff]  ;;  %v270_v15 = vld [vmem:[%s5506_s30 + $0x10] sm:$0xff]  ;;  %v269_v17 = vld [vmem:[%s5506_s30 + $0x8] sm:$0xff] }
  0x36   :  { %3380 = vmatpush3.msra.mxu1 %v374_v57  ;;  %3347 = vmatpush3.msra.mxu0 %v280_v58  ;;  %v364_v14 = vld [vmem:[%s5507_s23 + $0x18] sm:$0xff]  ;;  %v363_v16 = vld [vmem:[%s5507_s23 + $0x10] sm:$0xff]  ;;  %v362_v18 = vld [vmem:[%s5507_s23 + $0x8] sm:$0xff] }
  0x37   :  { %3381 = vmatprep.subr.mxu1 %v3924_v4  ;;  %3348 = vmatprep.subr.mxu0 %v3924_v4  ;;  %v268_v19 = vld [vmem:[%s5506_s30] sm:$0xff]  ;;  %v460_v38 = vld [vmem:[%s5478_s7 + $0x30] sm:$0xff]  ;;  %v459_v39 = vld [vmem:[%s5478_s7 + $0x28] sm:$0xff] }
  0x38   :  { %3382 = vmatpush3.msra.mxu1 %v373_v59  ;;  %3349 = vmatpush3.msra.mxu0 %v279_v60  ;;  %v361_v20 = vld [vmem:[%s5507_s23] sm:$0xff]  ;;  %v457_v41 = vld [vmem:[%s5478_s7 + $0x18] sm:$0xff]  ;;  %v456_v42 = vld [vmem:[%s5478_s7 + $0x10] sm:$0xff] }
  0x39   :  { %3383 = vmatprep.subr.mxu1 %v3924_v4  ;;  %3350 = vmatprep.subr.mxu0 %v3924_v4  ;;  %v2760_v23 = vld [vmem:[%s5508_s4] ss:$0 sm:$0xff]  ;;  %v455_v43 = vld [vmem:[%s5478_s7 + $0x8] sm:$0xff]  ;;  %v2802_v45 = vld [vmem:[%s5507_s23 + $0xf8] sm:$0xff] }
  0x3a   :  { %3384 = vmatpush3.msra.mxu1 %v372_v61  ;;  %3351 = vmatpush3.msra.mxu0 %v278_v62  ;;  %v458_v40 = vld [vmem:[%s5478_s7 + $0x20] sm:$0xff]  ;;  %v2801_v46 = vld [vmem:[%s5507_s23 + $0xf0] sm:$0xff]  ;;  %v2800_v47 = vld [vmem:[%s5507_s23 + $0xe8] sm:$0xff] }
  0x3b   :  { %3385 = vmatprep.subr.mxu1 %v3924_v4  ;;  %3352 = vmatprep.subr.mxu0 %v3924_v4  ;;  %v454_v44 = vld [vmem:[%s5478_s7] sm:$0xff]  ;;  %v2798_v49 = vld [vmem:[%s5507_s23 + $0xd8] sm:$0xff]  ;;  %v2797_v50 = vld [vmem:[%s5507_s23 + $0xd0] sm:$0xff] }
  0x3c   :  { %3386 = vmatpush3.msra.mxu1 %v371_v63  ;;  %3353 = vmatpush3.msra.mxu0 %v277_v0  ;;  %v2799_v48 = vld [vmem:[%s5507_s23 + $0xe0] sm:$0xff]  ;;  %v2796_v51 = vld [vmem:[%s5507_s23 + $0xc8] sm:$0xff]  ;;  %v2794_v53 = vld [vmem:[%s5507_s23 + $0xb8] sm:$0xff] }
  0x3d   :  { %3387 = vmatprep.subr.mxu1 %v3924_v4  ;;  %3354 = vmatprep.subr.mxu0 %v3924_v4  ;;  %v2795_v52 = vld [vmem:[%s5507_s23 + $0xc0] sm:$0xff]  ;;  %v2793_v54 = vld [vmem:[%s5507_s23 + $0xb0] sm:$0xff]  ;;  %v2792_v55 = vld [vmem:[%s5507_s23 + $0xa8] sm:$0xff] }
  0x3e   :  { %3388 = vmatpush3.msra.mxu1 %v370_v1  ;;  %3355 = vmatpush3.msra.mxu0 %v276_v2  ;;  %v2791_v56 = vld [vmem:[%s5507_s23 + $0xa0] sm:$0xff]  ;;  %v2790_v57 = vld [vmem:[%s5507_s23 + $0x98] sm:$0xff]  ;;  %v2789_v58 = vld [vmem:[%s5507_s23 + $0x90] sm:$0xff] }
  0x3f   :  { %3389 = vmatprep.subr.mxu1 %v3924_v4  ;;  %3356 = vmatprep.subr.mxu0 %v3924_v4  ;;  %v2788_v59 = vld [vmem:[%s5507_s23 + $0x88] sm:$0xff]  ;;  %v2787_v60 = vld [vmem:[%s5507_s23 + $0x80] sm:$0xff] }
  0x40   :  { %3390 = vmatpush3.msra.mxu1 %v369_v3  ;;  %3357 = vmatpush3.msra.mxu0 %v275_v5  ;;  %v2762_v61 = vld [vmem:[%s5477_s6] ss:$0 sm:$0xff] }
  0x41   :  { %3391 = vmatprep.subr.mxu1 %v3924_v4  ;;  %3358 = vmatprep.subr.mxu0 %v3924_v4  ;;  %v2761_v0 = vld [vmem:[%s5509_s1] ss:$0 sm:$0xff] }
  0x42   :  { %3392 = vmatpush3.msra.mxu1 %v368_v6  ;;  %3359 = vmatpush3.msra.mxu0 %v274_v7  ;;  %v2763_v6 = vld [vmem:[%s5479_s8] ss:$0 sm:$0xff] }
  0x43   :  { %3393 = vmatprep.subr.mxu1 %v3924_v4  ;;  %3360 = vmatprep.subr.mxu0 %v3924_v4 }
  0x44   :  { %3394 = vmatpush3.msra.mxu1 %v367_v8  ;;  %3361 = vmatpush3.msra.mxu0 %v273_v9 }
  0x45   :  { %3395 = vmatprep.subr.mxu1 %v3924_v4  ;;  %3362 = vmatprep.subr.mxu0 %v3924_v4 }
  0x46   :  { %3396 = vmatpush3.msra.mxu1 %v366_v10  ;;  %3363 = vmatpush3.msra.mxu0 %v272_v11  ;;  %v2804_v10 = vld [vmem:[%s5477_s6 + $0x1] ss:$0 sm:$0xff] }
  0x47   :  { %3397 = vmatprep.subr.mxu1 %v3924_v4  ;;  %3364 = vmatprep.subr.mxu0 %v3924_v4 }
  0x48   :  { %3372 = vmatprep.mubr.msk.f32.mxu0 %vm3925_vm0, %v3924_v4  ;;  %3407 = vmatprep.mubr.msk.f32.mxu1 %vm3925_vm0, %v3924_v4 }
  0x49   :  { %3398 = vmatpush3.msra.mxu1 %v365_v12  ;;  %3365 = vmatpush3.msra.mxu0 %v271_v13 }
  0x4a   :  { %3399 = vmatprep.subr.mxu1 %v3924_v4  ;;  %3366 = vmatprep.subr.mxu0 %v3924_v4 }
  0x4b   :  { %3400 = vmatpush3.msra.mxu1 %v364_v14  ;;  %3367 = vmatpush3.msra.mxu0 %v270_v15 }
  0x4c   :  { %3401 = vmatprep.subr.mxu1 %v3924_v4  ;;  %3368 = vmatprep.subr.mxu0 %v3924_v4 }
  0x4d   :  { %3402 = vmatpush3.msra.mxu1 %v363_v16  ;;  %3369 = vmatpush3.msra.mxu0 %v269_v17 }
  0x4e   :  { %3403 = vmatprep.subr.mxu1 %v3924_v4  ;;  %3370 = vmatprep.subr.mxu0 %v3924_v4 }
  0x4f   :  { %3404 = vmatpush3.msra.mxu1 %v362_v18  ;;  %3371 = vmatpush3.msra.mxu0 %v268_v19 }
  0x50   :  { %3405 = vmatprep.subr.mxu1 %v3924_v4  ;;  %3410 = vmatprep.subr.mxu0 %v3924_v4 }
  0x51   :  { %3406 = vmatpush3.msra.mxu1 %v361_v20 }
  0x52   :  { %3445 = vmatprep.subr.mxu1 %v3924_v4 }
  0xee   :  { %v2993_v21 = vpop.f32.mrf.mxu0 }
  0xf0   :  { %v2994_v22 = vpop.f32.mrf.mxu0  ;;  %v263_v24 = vpop.f32.mrf.mxu1 }
  0xf1   :  { %v2995_v25 = vadd.f32 %v2994_v22, %v2993_v21 }
  0xf2   :  { %v3339_v26 = vpop.f32.mrf.mxu1 }
  0xf3   :  { %v194_v27 = vadd.f32 %v2995_v25, %v2760_v23  ;;  %v713_v26 = vld [vmem:[%s5480_s9 + $0x18] sm:$0xff] }
  0xf5   :  { %v4345_v28 = vadd.f32 %v263_v24, %v194_v27  ;;  %v712_v27 = vld [vmem:[%s5480_s9 + $0x10] sm:$0xff] }
  0xf7   :  { %3373 = vmatmul.mubr.f32.vlgmr.msra.gmra.mxu0 %v4345_v28  ;;  %3408 = vmatmul.mubr.f32.vlgmr.msra.gmra.mxu1 %v4345_v28 }
  0xf8   :  { %3411 = vmatpush3.msra.mxu0 %v469_v29  ;;  %3442 = vmatprep.mubr.msk.f32.mxu0 %vm3925_vm0, %v3924_v4  ;;  %v711_v29 = vld [vmem:[%s5480_s9 + $0x8] sm:$0xff] }
  0xf9   :  { %3412 = vmatprep.subr.mxu0 %v3924_v4  ;;  %3447 = vmatprep.mubr.msk.f32.mxu1 %vm3925_vm0, %v3924_v4 }
  0xfa   :  { %3413 = vmatpush3.msra.mxu0 %v468_v30  ;;  %v710_v30 = vld [vmem:[%s5480_s9] sm:$0xff] }
  0xfb   :  { %3414 = vmatprep.subr.mxu0 %v3924_v4 }
  0xfc   :  { %3415 = vmatpush3.msra.mxu0 %v467_v31  ;;  %v2784_v31 = vld [vmem:[%s5506_s30 + $0xf8] sm:$0xff] }
  0xfd   :  { %3416 = vmatprep.subr.mxu0 %v3924_v4 }
  0xfe   :  { %3417 = vmatpush3.msra.mxu0 %v466_v32 }
  0xff   :  { %3418 = vmatprep.subr.mxu0 %v3924_v4 }
 0x100   :  { %3419 = vmatpush3.msra.mxu0 %v465_v33  ;;  %v2783_v33 = vld [vmem:[%s5506_s30 + $0xf0] sm:$0xff] }
 0x101   :  { %3420 = vmatprep.subr.mxu0 %v3924_v4 }
 0x102   :  { %3421 = vmatpush3.msra.mxu0 %v464_v34 }
 0x103   :  { %3422 = vmatprep.subr.mxu0 %v3924_v4 }
 0x104   :  { %3423 = vmatpush3.msra.mxu0 %v463_v35  ;;  %v2782_v35 = vld [vmem:[%s5506_s30 + $0xe8] sm:$0xff] }
 0x105   :  { %3424 = vmatprep.subr.mxu0 %v3924_v4 }
 0x106   :  { %3425 = vmatpush3.msra.mxu0 %v462_v36  ;;  %v2781_v36 = vld [vmem:[%s5506_s30 + $0xe0] sm:$0xff] }
 0x107   :  { %3426 = vmatprep.subr.mxu0 %v3924_v4 }
 0x108   :  { %3427 = vmatpush3.msra.mxu0 %v461_v37  ;;  %v2780_v37 = vld [vmem:[%s5506_s30 + $0xd8] sm:$0xff] }
 0x109   :  { %3428 = vmatprep.subr.mxu0 %v3924_v4 }
 0x10a   :  { %3429 = vmatpush3.msra.mxu0 %v460_v38  ;;  %v2779_v38 = vld [vmem:[%s5506_s30 + $0xd0] sm:$0xff] }
 0x10b   :  { %3430 = vmatprep.subr.mxu0 %v3924_v4 }
 0x10c   :  { %3431 = vmatpush3.msra.mxu0 %v459_v39  ;;  %v2778_v39 = vld [vmem:[%s5506_s30 + $0xc8] sm:$0xff] }
 0x10d   :  { %3432 = vmatprep.subr.mxu0 %v3924_v4 }
 0x10e   :  { %3433 = vmatpush3.msra.mxu0 %v458_v40  ;;  %v2777_v40 = vld [vmem:[%s5506_s30 + $0xc0] sm:$0xff] }
 0x10f   :  { %3434 = vmatprep.subr.mxu0 %v3924_v4 }
 0x110   :  { %3435 = vmatpush3.msra.mxu0 %v457_v41  ;;  %v2776_v41 = vld [vmem:[%s5506_s30 + $0xb8] sm:$0xff] }
 0x111   :  { %3436 = vmatprep.subr.mxu0 %v3924_v4 }
 0x112   :  { %3437 = vmatpush3.msra.mxu0 %v456_v42  ;;  %v2775_v42 = vld [vmem:[%s5506_s30 + $0xb0] sm:$0xff] }
 0x113   :  { %3438 = vmatprep.subr.mxu0 %v3924_v4 }
 0x114   :  { %3439 = vmatpush3.msra.mxu0 %v455_v43  ;;  %v2774_v43 = vld [vmem:[%s5506_s30 + $0xa8] sm:$0xff] }
 0x115   :  { %3440 = vmatprep.subr.mxu0 %v3924_v4 }
 0x116   :  { %3441 = vmatpush3.msra.mxu0 %v454_v44  ;;  %v2773_v44 = vld [vmem:[%s5506_s30 + $0xa0] sm:$0xff] }
 0x117   :  { %3443 = vmatmul.mubr.f32.vlgmr.msra.gmra.mxu0 %v4345_v28  ;;  %3501 = vmatprep.subr.mxu0 %v3924_v4 }
 0x118   :  { %3502 = vmatpush3.msra.mxu0 %v2802_v45  ;;  %3533 = vmatprep.mubr.msk.f32.mxu0 %vm3925_vm0, %v3924_v4  ;;  %v2772_v45 = vld [vmem:[%s5506_s30 + $0x98] sm:$0xff] }
 0x119   :  { %3503 = vmatprep.subr.mxu0 %v3924_v4 }
 0x11a   :  { %3504 = vmatpush3.msra.mxu0 %v2801_v46  ;;  %v2771_v46 = vld [vmem:[%s5506_s30 + $0x90] sm:$0xff] }
 0x11b   :  { %3505 = vmatprep.subr.mxu0 %v3924_v4 }
 0x11c   :  { %3506 = vmatpush3.msra.mxu0 %v2800_v47  ;;  %v2770_v47 = vld [vmem:[%s5506_s30 + $0x88] sm:$0xff] }
 0x11d   :  { %3507 = vmatprep.subr.mxu0 %v3924_v4 }
 0x11e   :  { %3508 = vmatpush3.msra.mxu0 %v2799_v48  ;;  %v2769_v48 = vld [vmem:[%s5506_s30 + $0x80] sm:$0xff] }
 0x11f   :  { %3509 = vmatprep.subr.mxu0 %v3924_v4 }
 0x120   :  { %3510 = vmatpush3.msra.mxu0 %v2798_v49  ;;  %v2820_v49 = vld [vmem:[%s5478_s7 + $0xf8] sm:$0xff] }
 0x121   :  { %3511 = vmatprep.subr.mxu0 %v3924_v4 }
 0x122   :  { %3512 = vmatpush3.msra.mxu0 %v2797_v50  ;;  %v2819_v50 = vld [vmem:[%s5478_s7 + $0xf0] sm:$0xff] }
 0x123   :  { %3513 = vmatprep.subr.mxu0 %v3924_v4 }
 0x124   :  { %3514 = vmatpush3.msra.mxu0 %v2796_v51  ;;  %v2818_v51 = vld [vmem:[%s5478_s7 + $0xe8] sm:$0xff] }
 0x125   :  { %3515 = vmatprep.subr.mxu0 %v3924_v4 }
 0x126   :  { %3516 = vmatpush3.msra.mxu0 %v2795_v52  ;;  %v2817_v52 = vld [vmem:[%s5478_s7 + $0xe0] sm:$0xff] }
 0x127   :  { %3517 = vmatprep.subr.mxu0 %v3924_v4 }
 0x128   :  { %3518 = vmatpush3.msra.mxu0 %v2794_v53  ;;  %v2816_v53 = vld [vmem:[%s5478_s7 + $0xd8] sm:$0xff] }
 0x129   :  { %3519 = vmatprep.subr.mxu0 %v3924_v4 }
 0x12a   :  { %3520 = vmatpush3.msra.mxu0 %v2793_v54  ;;  %v2815_v54 = vld [vmem:[%s5478_s7 + $0xd0] sm:$0xff] }
 0x12b   :  { %3521 = vmatprep.subr.mxu0 %v3924_v4 }
 0x12c   :  { %3522 = vmatpush3.msra.mxu0 %v2792_v55  ;;  %v2814_v55 = vld [vmem:[%s5478_s7 + $0xc8] sm:$0xff] }
 0x12d   :  { %3523 = vmatprep.subr.mxu0 %v3924_v4 }
 0x12e   :  { %3524 = vmatpush3.msra.mxu0 %v2791_v56  ;;  %v2813_v56 = vld [vmem:[%s5478_s7 + $0xc0] sm:$0xff] }
 0x12f   :  { %3525 = vmatprep.subr.mxu0 %v3924_v4 }
 0x130   :  { %3526 = vmatpush3.msra.mxu0 %v2790_v57  ;;  %v2812_v57 = vld [vmem:[%s5478_s7 + $0xb8] sm:$0xff] }
 0x131   :  { %3527 = vmatprep.subr.mxu0 %v3924_v4 }
 0x132   :  { %3528 = vmatpush3.msra.mxu0 %v2789_v58  ;;  %v2811_v58 = vld [vmem:[%s5478_s7 + $0xb0] sm:$0xff] }
 0x133   :  { %3529 = vmatprep.subr.mxu0 %v3924_v4 }
 0x134   :  { %3530 = vmatpush3.msra.mxu0 %v2788_v59  ;;  %v2810_v59 = vld [vmem:[%s5478_s7 + $0xa8] sm:$0xff] }
 0x135   :  { %3531 = vmatprep.subr.mxu0 %v3924_v4 }
 0x136   :  { %3532 = vmatpush3.msra.mxu0 %v2787_v60  ;;  %v2809_v60 = vld [vmem:[%s5478_s7 + $0xa0] sm:$0xff] }
 0x137   :  { %3534 = vmatmul.mubr.f32.vlgmr.msra.gmra.mxu0 %v4345_v28  ;;  %3571 = vmatprep.subr.mxu0 %v3924_v4 }
 0x138   :  { %3573 = vmatprep.mubr.msk.f32.mxu0 %vm3925_vm0, %v3924_v4 }
 0x1b7   :  { %v357_v62 = vpop.f32.mrf.mxu0  ;;  %v450_v63 = vpop.f32.mrf.mxu1 }
 0x1b8   :  { %v451_v1 = vadd.f32 %v2762_v61, %v450_v63  ;;  %v358_v5 = vadd.f32 %v2761_v0, %v357_v62  ;;  %v2808_v61 = vld [vmem:[%s5478_s7 + $0x98] sm:$0xff]  ;;  %v2807_v62 = vld [vmem:[%s5478_s7 + $0x90] sm:$0xff]  ;;  %v2806_v63 = vld [vmem:[%s5478_s7 + $0x88] sm:$0xff] }
 0x1b9   :  { %v3374_v2 = vpop.f32.mrf.mxu0  ;;  %v3409_v3 = vpop.f32.mrf.mxu1  ;;  %v2805_v0 = vld [vmem:[%s5478_s7 + $0x80] sm:$0xff] }
 0x1ba   :  { %3446 = vmatpush3.xpose.msk.msra.mxu1 %vm547_vm1, %v451_v1  ;;  %v2786_v3 = vld [vmem:[%s5509_s1 + $0x1] ss:$0 sm:$0xff] }
 0x1bb   :  { %3450 = vmatprep.subr.mxu1 %v3924_v4 }
 0x1bd   :  { %3448 = vmatmul.mubr.msk.f32.vlgmr.msra.gmra.mxu1 %vm547_vm1, %v358_v5 }
 0x1be   :  { %3452 = vmatprep.mubr.msk.f32.mxu1 %vm3925_vm0, %v3924_v4 }
 0x1d7   :  { %v543_v7 = vpop.f32.mrf.mxu0 }
 0x1d8   :  { %v544_v8 = vadd.f32 %v2763_v6, %v543_v7 }
 0x1d9   :  { %v3444_v9 = vpop.f32.mrf.mxu0 }
 0x1da   :  { %3451 = vmatpush3.msra.mxu1 %v544_v8  ;;  %v2822_v8 = vld [vmem:[%s5479_s8 + $0x1] ss:$0 sm:$0xff] }
 0x1db   :  { %3455 = vmatprep.subr.mxu1 %v3924_v4 }
 0x1f7   :  { %v980_v11 = vpop.f32.mrf.mxu0 }
 0x1f8   :  { %v981_v12 = vadd.f32 %v2804_v10, %v980_v11 }
 0x1f9   :  { %v3535_v13 = vpop.f32.mrf.mxu0 }
 0x1fa   :  { %3572 = vmatpush3.xpose.msk.msra.mxu0 %vm547_vm1, %v981_v12 }
 0x1fb   :  { %3576 = vmatprep.subr.mxu0 %v3924_v4 }
 0x27d   :  { %v620_v14 = vpop.f32.mrf.mxu1 }
 0x27e   :  { %v624_v15 = vmul.f32 0.17677669, %v620_v14 }
 0x27f   :  { %v3449_v16 = vpop.f32.mrf.mxu1 }
 0x280   :  { %v626_v17 = vsel %vm625_vm2, %v624_v15, -inf }
 0x281   :  { %627 = vmax.xlane.f32.xlu0 %v626_v17 }
 0x30a   :  { %v628_v18 = vpop.xlane.xlu0 %627 }
 0x30b   :  { %v629_v19 = vsub.f32 %v624_v15, %v628_v18 }
 0x30d   :  { %v630_v20 = vmul.f32 1.442695, %v629_v19 }
 0x30f   :  { %3882 = vpow2.f32 %v630_v20 }
 0x31c   :  { %v3883_v21 = vpop.eup %3882 }
 0x31d   :  { %v632_v22 = vsel %vm625_vm2, %v3883_v21, 0.0 }
 0x31e   :  { %633 = vadd.xlane.f32.xlu0 %v632_v22  ;;  %v2828_v22 = vld [vmem:[%s5480_s9 + $0x30] sm:$0xff] }
 0x3a7   :  { %v634_v23 = vpop.xlane.xlu0 %633 }
 0x3a8   :  { %3884 = vrcp.f32 %v634_v23  ;;  %v2827_v23 = vld [vmem:[%s5480_s9 + $0x28] sm:$0xff] }
 0x3b5   :  { %v3885_v24 = vpop.eup %3884 }
 0x3b6   :  { %v636_v25 = vmul.f32 %v3885_v24, %v3883_v21  ;;  %v2829_v21 = vld [vmem:[%s5480_s9 + $0x38] sm:$0xff]  ;;  %v2826_v24 = vld [vmem:[%s5480_s9 + $0x20] sm:$0xff] }
 0x3b8   :  { %3453 = vmatmul.mubr.msk.f32.vlgmr.msra.gmra.mxu1 %vm625_vm2, %v636_v25 }
 0x3b9   :  { %3456 = vmatpush3.msra.mxu1 %v713_v26  ;;  %3463 = vmatprep.mubr.msk.f32.mxu1 %vm3925_vm0, %v3924_v4 }
 0x3ba   :  { %3457 = vmatprep.subr.mxu1 %v3924_v4 }
 0x3bb   :  { %3458 = vmatpush3.msra.mxu1 %v712_v27 }
 0x3bc   :  { %3459 = vmatprep.subr.mxu1 %v3924_v4 }
 0x3bd   :  { %3460 = vmatpush3.msra.mxu1 %v711_v29  ;;  %v2846_v29 = vld [vmem:[%s5506_s30 + $0x178] sm:$0xff] }
 0x3be   :  { %3461 = vmatprep.subr.mxu1 %v3924_v4 }
 0x3bf   :  { %3462 = vmatpush3.msra.mxu1 %v710_v30  ;;  %v2845_v30 = vld [vmem:[%s5506_s30 + $0x170] sm:$0xff] }
 0x3c0   :  { %3466 = vmatprep.subr.mxu1 %v3924_v4 }
 0x478   :  { %v706_v32 = vpop.f32.mrf.mxu1 }
 0x479   :  { %3464 = vmatmul.mubr.msk.f32.vlgmr.msra.gmra.mxu1 %vm547_vm1, %v706_v32  ;;  %v2843_v32 = vld [vmem:[%s5506_s30 + $0x160] sm:$0xff] }
 0x47a   :  { %3467 = vmatpush3.msra.mxu1 %v2784_v31  ;;  %v3454_v34 = vpop.f32.mrf.mxu1  ;;  %3498 = vmatprep.mubr.msk.f32.mxu1 %vm3925_vm0, %v3924_v4  ;;  %v2844_v31 = vld [vmem:[%s5506_s30 + $0x168] sm:$0xff] }
 0x47b   :  { %3468 = vmatprep.subr.mxu1 %v3924_v4  ;;  %v2841_v34 = vld [vmem:[%s5506_s30 + $0x150] sm:$0xff] }
 0x47c   :  { %3469 = vmatpush3.msra.mxu1 %v2783_v33  ;;  %v2842_v33 = vld [vmem:[%s5506_s30 + $0x158] sm:$0xff] }
 0x47d   :  { %3470 = vmatprep.subr.mxu1 %v3924_v4 }
 0x47e   :  { %3471 = vmatpush3.msra.mxu1 %v2782_v35  ;;  %v2840_v35 = vld [vmem:[%s5506_s30 + $0x148] sm:$0xff] }
 0x47f   :  { %3472 = vmatprep.subr.mxu1 %v3924_v4 }
 0x480   :  { %3473 = vmatpush3.msra.mxu1 %v2781_v36  ;;  %v2839_v36 = vld [vmem:[%s5506_s30 + $0x140] sm:$0xff] }
 0x481   :  { %3474 = vmatprep.subr.mxu1 %v3924_v4 }
 0x482   :  { %3475 = vmatpush3.msra.mxu1 %v2780_v37  ;;  %v2838_v37 = vld [vmem:[%s5506_s30 + $0x138] sm:$0xff] }
 0x483   :  { %3476 = vmatprep.subr.mxu1 %v3924_v4 }
 0x484   :  { %3477 = vmatpush3.msra.mxu1 %v2779_v38  ;;  %v2837_v38 = vld [vmem:[%s5506_s30 + $0x130] sm:$0xff] }
 0x485   :  { %3478 = vmatprep.subr.mxu1 %v3924_v4 }
 0x486   :  { %3479 = vmatpush3.msra.mxu1 %v2778_v39  ;;  %v2836_v39 = vld [vmem:[%s5506_s30 + $0x128] sm:$0xff] }
 0x487   :  { %3480 = vmatprep.subr.mxu1 %v3924_v4 }
 0x488   :  { %3481 = vmatpush3.msra.mxu1 %v2777_v40  ;;  %v2835_v40 = vld [vmem:[%s5506_s30 + $0x120] sm:$0xff] }
 0x489   :  { %3482 = vmatprep.subr.mxu1 %v3924_v4 }
 0x48a   :  { %3483 = vmatpush3.msra.mxu1 %v2776_v41  ;;  %v2834_v41 = vld [vmem:[%s5506_s30 + $0x118] sm:$0xff] }
 0x48b   :  { %3484 = vmatprep.subr.mxu1 %v3924_v4 }
 0x48c   :  { %3485 = vmatpush3.msra.mxu1 %v2775_v42  ;;  %v2833_v42 = vld [vmem:[%s5506_s30 + $0x110] sm:$0xff] }
 0x48d   :  { %3486 = vmatprep.subr.mxu1 %v3924_v4 }
 0x48e   :  { %3487 = vmatpush3.msra.mxu1 %v2774_v43  ;;  %v2832_v43 = vld [vmem:[%s5506_s30 + $0x108] sm:$0xff] }
 0x48f   :  { %3488 = vmatprep.subr.mxu1 %v3924_v4 }
 0x490   :  { %3489 = vmatpush3.msra.mxu1 %v2773_v44  ;;  %v2831_v44 = vld [vmem:[%s5506_s30 + $0x100] sm:$0xff] }
 0x491   :  { %3490 = vmatprep.subr.mxu1 %v3924_v4 }
 0x492   :  { %3491 = vmatpush3.msra.mxu1 %v2772_v45  ;;  %v2882_v45 = vld [vmem:[%s5478_s7 + $0x178] sm:$0xff] }
 0x493   :  { %3492 = vmatprep.subr.mxu1 %v3924_v4 }
 0x494   :  { %3493 = vmatpush3.msra.mxu1 %v2771_v46  ;;  %v2881_v46 = vld [vmem:[%s5478_s7 + $0x170] sm:$0xff] }
 0x495   :  { %3494 = vmatprep.subr.mxu1 %v3924_v4 }
 0x496   :  { %3495 = vmatpush3.msra.mxu1 %v2770_v47  ;;  %v2880_v47 = vld [vmem:[%s5478_s7 + $0x168] sm:$0xff] }
 0x497   :  { %3496 = vmatprep.subr.mxu1 %v3924_v4 }
 0x498   :  { %3497 = vmatpush3.msra.mxu1 %v2769_v48  ;;  %v2879_v48 = vld [vmem:[%s5478_s7 + $0x160] sm:$0xff] }
 0x499   :  { %3499 = vmatmul.mubr.f32.vlgmr.msra.gmra.mxu1 %v4345_v28  ;;  %3536 = vmatprep.subr.mxu1 %v3924_v4 }
 0x49a   :  { %3537 = vmatpush3.msra.mxu1 %v2820_v49  ;;  %3568 = vmatprep.mubr.msk.f32.mxu1 %vm3925_vm0, %v3924_v4  ;;  %v2878_v49 = vld [vmem:[%s5478_s7 + $0x158] sm:$0xff] }
 0x49b   :  { %3538 = vmatprep.subr.mxu1 %v3924_v4 }
 0x49c   :  { %3539 = vmatpush3.msra.mxu1 %v2819_v50  ;;  %v2877_v50 = vld [vmem:[%s5478_s7 + $0x150] sm:$0xff] }
 0x49d   :  { %3540 = vmatprep.subr.mxu1 %v3924_v4 }
 0x49e   :  { %3541 = vmatpush3.msra.mxu1 %v2818_v51  ;;  %v2876_v51 = vld [vmem:[%s5478_s7 + $0x148] sm:$0xff] }
 0x49f   :  { %3542 = vmatprep.subr.mxu1 %v3924_v4 }
 0x4a0   :  { %3543 = vmatpush3.msra.mxu1 %v2817_v52  ;;  %v2875_v52 = vld [vmem:[%s5478_s7 + $0x140] sm:$0xff] }
 0x4a1   :  { %3544 = vmatprep.subr.mxu1 %v3924_v4 }
 0x4a2   :  { %3545 = vmatpush3.msra.mxu1 %v2816_v53  ;;  %v2874_v53 = vld [vmem:[%s5478_s7 + $0x138] sm:$0xff] }
 0x4a3   :  { %3546 = vmatprep.subr.mxu1 %v3924_v4 }
 0x4a4   :  { %3547 = vmatpush3.msra.mxu1 %v2815_v54  ;;  %v2873_v54 = vld [vmem:[%s5478_s7 + $0x130] sm:$0xff] }
 0x4a5   :  { %3548 = vmatprep.subr.mxu1 %v3924_v4 }
 0x4a6   :  { %3549 = vmatpush3.msra.mxu1 %v2814_v55  ;;  %v2872_v55 = vld [vmem:[%s5478_s7 + $0x128] sm:$0xff] }
 0x4a7   :  { %3550 = vmatprep.subr.mxu1 %v3924_v4 }
 0x4a8   :  { %3551 = vmatpush3.msra.mxu1 %v2813_v56  ;;  %v2871_v56 = vld [vmem:[%s5478_s7 + $0x120] sm:$0xff] }
 0x4a9   :  { %3552 = vmatprep.subr.mxu1 %v3924_v4 }
 0x4aa   :  { %3553 = vmatpush3.msra.mxu1 %v2812_v57  ;;  %v2870_v57 = vld [vmem:[%s5478_s7 + $0x118] sm:$0xff] }
 0x4ab   :  { %3554 = vmatprep.subr.mxu1 %v3924_v4 }
 0x4ac   :  { %3555 = vmatpush3.msra.mxu1 %v2811_v58  ;;  %v2869_v58 = vld [vmem:[%s5478_s7 + $0x110] sm:$0xff] }
 0x4ad   :  { %3556 = vmatprep.subr.mxu1 %v3924_v4 }
 0x4ae   :  { %3557 = vmatpush3.msra.mxu1 %v2810_v59  ;;  %v2868_v59 = vld [vmem:[%s5478_s7 + $0x108] sm:$0xff] }
 0x4af   :  { %3558 = vmatprep.subr.mxu1 %v3924_v4 }
 0x4b0   :  { %3559 = vmatpush3.msra.mxu1 %v2809_v60  ;;  %v2867_v60 = vld [vmem:[%s5478_s7 + $0x100] sm:$0xff] }
 0x4b1   :  { %3560 = vmatprep.subr.mxu1 %v3924_v4 }
 0x4b2   :  { %3561 = vmatpush3.msra.mxu1 %v2808_v61  ;;  %v2926_v61 = vld [vmem:[%s5507_s23 + $0x1f8] sm:$0xff] }
 0x4b3   :  { %3562 = vmatprep.subr.mxu1 %v3924_v4 }
 0x4b4   :  { %3563 = vmatpush3.msra.mxu1 %v2807_v62  ;;  %v2925_v62 = vld [vmem:[%s5507_s23 + $0x1f0] sm:$0xff] }
 0x4b5   :  { %3564 = vmatprep.subr.mxu1 %v3924_v4 }
 0x4b6   :  { %3565 = vmatpush3.msra.mxu1 %v2806_v63  ;;  %v2924_v63 = vld [vmem:[%s5507_s23 + $0x1e8] sm:$0xff] }
 0x4b7   :  { %3566 = vmatprep.subr.mxu1 %v3924_v4 }
 0x4b8   :  { %3567 = vmatpush3.msra.mxu1 %v2805_v0  ;;  %v2923_v0 = vld [vmem:[%s5507_s23 + $0x1e0] sm:$0xff] }
 0x4b9   :  { %3569 = vmatmul.mubr.f32.vlgmr.msra.gmra.mxu1 %v4345_v28  ;;  %3581 = vmatprep.subr.mxu1 %v3924_v4 }
 0x4ba   :  { %3589 = vmatprep.mubr.msk.f32.mxu1 %vm3925_vm0, %v3924_v4  ;;  %3582 = vmatpush3.msra.mxu1 %v2829_v21  ;;  %v2860_v21 = vld [vmem:[%s5507_s23 + $0x158] sm:$0xff] }
 0x4bb   :  { %3583 = vmatprep.subr.mxu1 %v3924_v4 }
 0x4bc   :  { %3584 = vmatpush3.msra.mxu1 %v2828_v22  ;;  %v2859_v22 = vld [vmem:[%s5507_s23 + $0x150] sm:$0xff] }
 0x4bd   :  { %3585 = vmatprep.subr.mxu1 %v3924_v4 }
 0x4be   :  { %3586 = vmatpush3.msra.mxu1 %v2827_v23  ;;  %v2858_v23 = vld [vmem:[%s5507_s23 + $0x148] sm:$0xff] }
 0x4bf   :  { %3587 = vmatprep.subr.mxu1 %v3924_v4 }
 0x4c0   :  { %3588 = vmatpush3.msra.mxu1 %v2826_v24  ;;  %v2857_v24 = vld [vmem:[%s5507_s23 + $0x140] sm:$0xff] }
 0x4c1   :  { %3627 = vmatprep.subr.mxu1 %v3924_v4 }
 0x539   :  { %v4665_v1 = vpop.f32.mrf.mxu1 }
 0x53b   :  { %v3465_v2 = vpop.f32.mrf.mxu1 }
 0x53c   :  { %v2922_v2 = vld [vmem:[%s5507_s23 + $0x1d8] sm:$0xff] }
 0x559   :  { %v885_v5 = vpop.f32.mrf.mxu1 }
 0x55a   :  { %v886_v6 = vadd.f32 %v2786_v3, %v885_v5  ;;  %v2921_v3 = vld [vmem:[%s5507_s23 + $0x1d0] sm:$0xff]  ;;  %v2920_v5 = vld [vmem:[%s5507_s23 + $0x1c8] sm:$0xff] }
 0x55b   :  { %v3500_v7 = vpop.f32.mrf.mxu1 }
 0x55c   :  { %3574 = vmatmul.mubr.msk.f32.vlgmr.msra.gmra.mxu0 %vm547_vm1, %v886_v6  ;;  %v2919_v6 = vld [vmem:[%s5507_s23 + $0x1c0] sm:$0xff]  ;;  %v2918_v7 = vld [vmem:[%s5507_s23 + $0x1b8] sm:$0xff] }
 0x55d   :  { %3578 = vmatprep.mubr.msk.f32.mxu0 %vm3925_vm0, %v3924_v4 }
 0x579   :  { %v1075_v9 = vpop.f32.mrf.mxu1 }
 0x57a   :  { %v1076_v10 = vadd.f32 %v2822_v8, %v1075_v9  ;;  %v2917_v8 = vld [vmem:[%s5507_s23 + $0x1b0] sm:$0xff]  ;;  %v2916_v9 = vld [vmem:[%s5507_s23 + $0x1a8] sm:$0xff] }
 0x57b   :  { %v3570_v11 = vpop.f32.mrf.mxu1 }
 0x57c   :  { %3577 = vmatpush3.msra.mxu0 %v1076_v10  ;;  %v2915_v10 = vld [vmem:[%s5507_s23 + $0x1a0] sm:$0xff]  ;;  %v2914_v11 = vld [vmem:[%s5507_s23 + $0x198] sm:$0xff] }
 0x57d   :  { %3592 = vmatprep.subr.mxu0 %v3924_v4 }
 0x61c   :  { %v1151_v12 = vpop.f32.mrf.mxu0 }
 0x61d   :  { %v1155_v13 = vmul.f32 0.17677669, %v1151_v12  ;;  %v2913_v12 = vld [vmem:[%s5507_s23 + $0x190] sm:$0xff] }
 0x61e   :  { %v3575_v14 = vpop.f32.mrf.mxu0 }
 0x61f   :  { %v1156_v15 = vsel %vm625_vm2, %v1155_v13, -inf  ;;  %v2911_v14 = vld [vmem:[%s5507_s23 + $0x180] sm:$0xff] }
 0x620   :  { %1157 = vmax.xlane.f32.xlu1 %v1156_v15  ;;  %v2864_v15 = vld [vmem:[%s5507_s23 + $0x178] sm:$0xff] }
 0x6a9   :  { %v1158_v16 = vpop.xlane.xlu1 %1157 }
 0x6aa   :  { %v1159_v17 = vsub.f32 %v1155_v13, %v1158_v16  ;;  %v2912_v13 = vld [vmem:[%s5507_s23 + $0x188] sm:$0xff] }
 0x6ac   :  { %v1160_v18 = vmul.f32 1.442695, %v1159_v17  ;;  %v2863_v17 = vld [vmem:[%s5507_s23 + $0x170] sm:$0xff] }
 0x6ae   :  { %3886 = vpow2.f32 %v1160_v18 }
 0x6bb   :  { %v3887_v19 = vpop.eup %3886 }
 0x6bc   :  { %v1162_v20 = vsel %vm625_vm2, %v3887_v19, 0.0 }
 0x6bd   :  { %1163 = vadd.xlane.f32.xlu1 %v1162_v20  ;;  %v2861_v20 = vld [vmem:[%s5507_s23 + $0x160] sm:$0xff] }
 0x746   :  { %v1164_v25 = vpop.xlane.xlu1 %1163 }
 0x747   :  { %3888 = vrcp.f32 %v1164_v25  ;;  %v2856_v25 = vld [vmem:[%s5507_s23 + $0x138] sm:$0xff] }
 0x754   :  { %v3889_v26 = vpop.eup %3888 }
 0x755   :  { %v1166_v27 = vmul.f32 %v3889_v26, %v3887_v19  ;;  %v2862_v19 = vld [vmem:[%s5507_s23 + $0x168] sm:$0xff]  ;;  %v2855_v26 = vld [vmem:[%s5507_s23 + $0x130] sm:$0xff] }
 0x757   :  { %3579 = vmatmul.mubr.msk.f32.vlgmr.msra.gmra.mxu0 %vm625_vm2, %v1166_v27  ;;  %v2854_v27 = vld [vmem:[%s5507_s23 + $0x128] sm:$0xff] }
 0x758   :  { %3593 = vmatpush3.msra.mxu0 %v2846_v29  ;;  %3624 = vmatprep.mubr.msk.f32.mxu0 %vm3925_vm0, %v3924_v4  ;;  %v2853_v29 = vld [vmem:[%s5507_s23 + $0x120] sm:$0xff] }
 0x759   :  { %3594 = vmatprep.subr.mxu0 %v3924_v4 }
 0x75a   :  { %3595 = vmatpush3.msra.mxu0 %v2845_v30  ;;  %v2852_v30 = vld [vmem:[%s5507_s23 + $0x118] sm:$0xff] }
 0x75b   :  { %3596 = vmatprep.subr.mxu0 %v3924_v4 }
 0x75c   :  { %3597 = vmatpush3.msra.mxu0 %v2844_v31  ;;  %v2851_v31 = vld [vmem:[%s5507_s23 + $0x110] sm:$0xff] }
 0x75d   :  { %3598 = vmatprep.subr.mxu0 %v3924_v4 }
 0x75e   :  { %3599 = vmatpush3.msra.mxu0 %v2843_v32  ;;  %v2850_v32 = vld [vmem:[%s5507_s23 + $0x108] sm:$0xff] }
 0x75f   :  { %3600 = vmatprep.subr.mxu0 %v3924_v4 }
 0x760   :  { %3601 = vmatpush3.msra.mxu0 %v2842_v33  ;;  %v2849_v33 = vld [vmem:[%s5507_s23 + $0x100] sm:$0xff] }
 0x761   :  { %3602 = vmatprep.subr.mxu0 %v3924_v4 }
 0x762   :  { %3603 = vmatpush3.msra.mxu0 %v2841_v34 }
 0x763   :  { %3604 = vmatprep.subr.mxu0 %v3924_v4 }
 0x764   :  { %3605 = vmatpush3.msra.mxu0 %v2840_v35 }
 0x765   :  { %3606 = vmatprep.subr.mxu0 %v3924_v4 }
 0x766   :  { %3607 = vmatpush3.msra.mxu0 %v2839_v36 }
 0x767   :  { %3608 = vmatprep.subr.mxu0 %v3924_v4 }
 0x768   :  { %3609 = vmatpush3.msra.mxu0 %v2838_v37 }
 0x769   :  { %3610 = vmatprep.subr.mxu0 %v3924_v4 }
 0x76a   :  { %3611 = vmatpush3.msra.mxu0 %v2837_v38  ;;  %v2928_v38 = vld [vmem:[%s5477_s6 + $0x3] ss:$0 sm:$0xff] }
 0x76b   :  { %3612 = vmatprep.subr.mxu0 %v3924_v4 }
 0x76c   :  { %3613 = vmatpush3.msra.mxu0 %v2836_v39 }
 0x76d   :  { %3614 = vmatprep.subr.mxu0 %v3924_v4 }
 0x76e   :  { %3615 = vmatpush3.msra.mxu0 %v2835_v40 }
 0x76f   :  { %3616 = vmatprep.subr.mxu0 %v3924_v4 }
 0x770   :  { %3617 = vmatpush3.msra.mxu0 %v2834_v41 }
 0x771   :  { %3618 = vmatprep.subr.mxu0 %v3924_v4 }
 0x772   :  { %3619 = vmatpush3.msra.mxu0 %v2833_v42  ;;  %v2768_v42 = vld [vmem:[%s5481_s10] ss:$0 sm:$0xff] }
 0x773   :  { %3620 = vmatprep.subr.mxu0 %v3924_v4 }
 0x774   :  { %3621 = vmatpush3.msra.mxu0 %v2832_v43  ;;  %v793_v43 = vadd.f32 %v2768_v42, %v4665_v1  ;;  %v2929_v42 = vld [vmem:[%s5478_s7 + $0x180] sm:$0xff] }
 0x775   :  { %3622 = vmatprep.subr.mxu0 %v3924_v4 }
 0x776   :  { %3623 = vmatpush3.msra.mxu0 %v2831_v44 }
 0x777   :  { %3625 = vmatmul.mubr.f32.vlgmr.msra.gmra.mxu0 %v4345_v28  ;;  %3662 = vmatprep.subr.mxu0 %v3924_v4 }
 0x778   :  { %3663 = vmatpush3.msra.mxu0 %v2882_v45  ;;  %3694 = vmatprep.mubr.msk.f32.mxu0 %vm3925_vm0, %v3924_v4 }
 0x779   :  { %3664 = vmatprep.subr.mxu0 %v3924_v4 }
 0x77a   :  { %3665 = vmatpush3.msra.mxu0 %v2881_v46 }
 0x77b   :  { %3666 = vmatprep.subr.mxu0 %v3924_v4 }
 0x77c   :  { %3667 = vmatpush3.msra.mxu0 %v2880_v47  ;;  %v2866_v47 = vld [vmem:[%s5477_s6 + $0x2] ss:$0 sm:$0xff]  ;;  %s3926_s6 = smov [#allocation2]  }
 0x77d   :  { %3668 = vmatprep.subr.mxu0 %v3924_v4 }
 0x77e   :  { %3669 = vmatpush3.msra.mxu0 %v2879_v48 }
 0x77f   :  { %3670 = vmatprep.subr.mxu0 %v3924_v4 }
 0x780   :  { %3671 = vmatpush3.msra.mxu0 %v2878_v49  ;;  %v2848_v49 = vld [vmem:[%s5509_s1 + $0x2] ss:$0 sm:$0xff] }
 0x781   :  { %3672 = vmatprep.subr.mxu0 %v3924_v4 }
 0x782   :  { %3673 = vmatpush3.msra.mxu0 %v2877_v50 }
 0x783   :  { %3674 = vmatprep.subr.mxu0 %v3924_v4 }
 0x784   :  { %3675 = vmatpush3.msra.mxu0 %v2876_v51  ;;  %v2884_v51 = vld [vmem:[%s5479_s8 + $0x2] ss:$0 sm:$0xff] }
 0x785   :  { %3676 = vmatprep.subr.mxu0 %v3924_v4 }
 0x786   :  { %3677 = vmatpush3.msra.mxu0 %v2875_v52 }
 0x787   :  { %3678 = vmatprep.subr.mxu0 %v3924_v4 }
 0x788   :  { %3679 = vmatpush3.msra.mxu0 %v2874_v53 }
 0x789   :  { %3680 = vmatprep.subr.mxu0 %v3924_v4 }
 0x78a   :  { %3681 = vmatpush3.msra.mxu0 %v2873_v54 }
 0x78b   :  { %3682 = vmatprep.subr.mxu0 %v3924_v4 }
 0x78c   :  { %3683 = vmatpush3.msra.mxu0 %v2872_v55 }
 0x78d   :  { %3684 = vmatprep.subr.mxu0 %v3924_v4 }
 0x78e   :  { %3685 = vmatpush3.msra.mxu0 %v2871_v56 }
 0x78f   :  { %3686 = vmatprep.subr.mxu0 %v3924_v4 }
 0x790   :  { %3687 = vmatpush3.msra.mxu0 %v2870_v57 }
 0x791   :  { %3688 = vmatprep.subr.mxu0 %v3924_v4 }
 0x792   :  { %3689 = vmatpush3.msra.mxu0 %v2869_v58 }
 0x793   :  { %3690 = vmatprep.subr.mxu0 %v3924_v4 }
 0x794   :  { %3691 = vmatpush3.msra.mxu0 %v2868_v59 }
 0x795   :  { %3692 = vmatprep.subr.mxu0 %v3924_v4 }
 0x796   :  { %3693 = vmatpush3.msra.mxu0 %v2867_v60 }
 0x797   :  { %3695 = vmatmul.mubr.f32.vlgmr.msra.gmra.mxu0 %v4345_v28  ;;  %3753 = vmatprep.subr.mxu0 %v3924_v4 }
 0x798   :  { %3754 = vmatpush3.msra.mxu0 %v2926_v61  ;;  %3785 = vmatprep.mubr.msk.f32.mxu0 %vm3925_vm0, %v3924_v4 }
 0x799   :  { %3755 = vmatprep.subr.mxu0 %v3924_v4 }
 0x79a   :  { %3756 = vmatpush3.msra.mxu0 %v2925_v62 }
 0x79b   :  { %3757 = vmatprep.subr.mxu0 %v3924_v4 }
 0x79c   :  { %3758 = vmatpush3.msra.mxu0 %v2924_v63 }
 0x79d   :  { %3759 = vmatprep.subr.mxu0 %v3924_v4 }
 0x79e   :  { %3760 = vmatpush3.msra.mxu0 %v2923_v0 }
 0x79f   :  { %3761 = vmatprep.subr.mxu0 %v3924_v4 }
 0x7a0   :  { %3762 = vmatpush3.msra.mxu0 %v2922_v2 }
 0x7a1   :  { %3763 = vmatprep.subr.mxu0 %v3924_v4 }
 0x7a2   :  { %3764 = vmatpush3.msra.mxu0 %v2921_v3  ;;  %v2891_v3 = vld [vmem:[%s5480_s9 + $0x58] sm:$0xff] }
 0x7a3   :  { %3765 = vmatprep.subr.mxu0 %v3924_v4 }
 0x7a4   :  { %3766 = vmatpush3.msra.mxu0 %v2920_v5  ;;  %v2890_v5 = vld [vmem:[%s5480_s9 + $0x50] sm:$0xff] }
 0x7a5   :  { %3767 = vmatprep.subr.mxu0 %v3924_v4 }
 0x7a6   :  { %3768 = vmatpush3.msra.mxu0 %v2919_v6  ;;  %v2889_v6 = vld [vmem:[%s5480_s9 + $0x48] sm:$0xff] }
 0x7a7   :  { %3769 = vmatprep.subr.mxu0 %v3924_v4 }
 0x7a8   :  { %3770 = vmatpush3.msra.mxu0 %v2918_v7  ;;  %v2888_v7 = vld [vmem:[%s5480_s9 + $0x40] sm:$0xff] }
 0x7a9   :  { %3771 = vmatprep.subr.mxu0 %v3924_v4 }
 0x7aa   :  { %3772 = vmatpush3.msra.mxu0 %v2917_v8  ;;  %v2908_v8 = vld [vmem:[%s5506_s30 + $0x1f8] sm:$0xff] }
 0x7ab   :  { %3773 = vmatprep.subr.mxu0 %v3924_v4 }
 0x7ac   :  { %3774 = vmatpush3.msra.mxu0 %v2916_v9 }
 0x7ad   :  { %3775 = vmatprep.subr.mxu0 %v3924_v4 }
 0x7ae   :  { %3776 = vmatpush3.msra.mxu0 %v2915_v10  ;;  %v2907_v10 = vld [vmem:[%s5506_s30 + $0x1f0] sm:$0xff] }
 0x7af   :  { %3777 = vmatprep.subr.mxu0 %v3924_v4 }
 0x7b0   :  { %3778 = vmatpush3.msra.mxu0 %v2914_v11 }
 0x7b1   :  { %3779 = vmatprep.subr.mxu0 %v3924_v4 }
 0x7b2   :  { %3780 = vmatpush3.msra.mxu0 %v2913_v12  ;;  %v2906_v12 = vld [vmem:[%s5506_s30 + $0x1e8] sm:$0xff] }
 0x7b3   :  { %3781 = vmatprep.subr.mxu0 %v3924_v4 }
 0x7b4   :  { %3782 = vmatpush3.msra.mxu0 %v2912_v13  ;;  %v2905_v13 = vld [vmem:[%s5506_s30 + $0x1e0] sm:$0xff] }
 0x7b5   :  { %3783 = vmatprep.subr.mxu0 %v3924_v4 }
 0x7b6   :  { %3784 = vmatpush3.msra.mxu0 %v2911_v14  ;;  %v2904_v14 = vld [vmem:[%s5506_s30 + $0x1d8] sm:$0xff] }
 0x7b7   :  { %3786 = vmatmul.mubr.f32.vlgmr.msra.gmra.mxu0 %v4345_v28  ;;  %3823 = vmatprep.subr.mxu0 %v3924_v4 }
 0x7b8   :  { %3825 = vmatprep.mubr.msk.f32.mxu0 %vm3925_vm0, %v3924_v4 }
 0x817   :  { %v1236_v16 = vpop.f32.mrf.mxu0 }
 0x818   :  { %3590 = vmatmul.mubr.msk.f32.vlgmr.msra.gmra.mxu1 %vm547_vm1, %v1236_v16  ;;  %v2902_v16 = vld [vmem:[%s5506_s30 + $0x1c8] sm:$0xff] }
 0x819   :  { %3628 = vmatpush3.msra.mxu1 %v2864_v15  ;;  %v3580_v18 = vpop.f32.mrf.mxu0  ;;  %3659 = vmatprep.mubr.msk.f32.mxu1 %vm3925_vm0, %v3924_v4  ;;  %v2903_v15 = vld [vmem:[%s5506_s30 + $0x1d0] sm:$0xff] }
 0x81a   :  { %3629 = vmatprep.subr.mxu1 %v3924_v4  ;;  %v2900_v18 = vld [vmem:[%s5506_s30 + $0x1b8] sm:$0xff] }
 0x81b   :  { %3630 = vmatpush3.msra.mxu1 %v2863_v17  ;;  %v2901_v17 = vld [vmem:[%s5506_s30 + $0x1c0] sm:$0xff] }
 0x81c   :  { %3631 = vmatprep.subr.mxu1 %v3924_v4 }
 0x81d   :  { %3632 = vmatpush3.msra.mxu1 %v2862_v19  ;;  %v2899_v19 = vld [vmem:[%s5506_s30 + $0x1b0] sm:$0xff] }
 0x81e   :  { %3633 = vmatprep.subr.mxu1 %v3924_v4 }
 0x81f   :  { %3634 = vmatpush3.msra.mxu1 %v2861_v20  ;;  %v2898_v20 = vld [vmem:[%s5506_s30 + $0x1a8] sm:$0xff] }
 0x820   :  { %3635 = vmatprep.subr.mxu1 %v3924_v4 }
 0x821   :  { %3636 = vmatpush3.msra.mxu1 %v2860_v21  ;;  %v2897_v21 = vld [vmem:[%s5506_s30 + $0x1a0] sm:$0xff] }
 0x822   :  { %3637 = vmatprep.subr.mxu1 %v3924_v4 }
 0x823   :  { %3638 = vmatpush3.msra.mxu1 %v2859_v22  ;;  %v2896_v22 = vld [vmem:[%s5506_s30 + $0x198] sm:$0xff] }
 0x824   :  { %3639 = vmatprep.subr.mxu1 %v3924_v4 }
 0x825   :  { %3640 = vmatpush3.msra.mxu1 %v2858_v23  ;;  %v2895_v23 = vld [vmem:[%s5506_s30 + $0x190] sm:$0xff] }
 0x826   :  { %3641 = vmatprep.subr.mxu1 %v3924_v4 }
 0x827   :  { %3642 = vmatpush3.msra.mxu1 %v2857_v24  ;;  %v2894_v24 = vld [vmem:[%s5506_s30 + $0x188] sm:$0xff] }
 0x828   :  { %3643 = vmatprep.subr.mxu1 %v3924_v4 }
 0x829   :  { %3644 = vmatpush3.msra.mxu1 %v2856_v25  ;;  %v2893_v25 = vld [vmem:[%s5506_s30 + $0x180] sm:$0xff] }
 0x82a   :  { %3645 = vmatprep.subr.mxu1 %v3924_v4 }
 0x82b   :  { %3646 = vmatpush3.msra.mxu1 %v2855_v26  ;;  %v2944_v26 = vld [vmem:[%s5478_s7 + $0x1f8] sm:$0xff] }
 0x82c   :  { %3647 = vmatprep.subr.mxu1 %v3924_v4 }
 0x82d   :  { %3648 = vmatpush3.msra.mxu1 %v2854_v27  ;;  %v2943_v27 = vld [vmem:[%s5478_s7 + $0x1f0] sm:$0xff] }
 0x82e   :  { %3649 = vmatprep.subr.mxu1 %v3924_v4 }
 0x82f   :  { %3650 = vmatpush3.msra.mxu1 %v2853_v29  ;;  %v2942_v29 = vld [vmem:[%s5478_s7 + $0x1e8] sm:$0xff] }
 0x830   :  { %3651 = vmatprep.subr.mxu1 %v3924_v4 }
 0x831   :  { %3652 = vmatpush3.msra.mxu1 %v2852_v30  ;;  %v2941_v30 = vld [vmem:[%s5478_s7 + $0x1e0] sm:$0xff] }
 0x832   :  { %3653 = vmatprep.subr.mxu1 %v3924_v4 }
 0x833   :  { %3654 = vmatpush3.msra.mxu1 %v2851_v31  ;;  %v2940_v31 = vld [vmem:[%s5478_s7 + $0x1d8] sm:$0xff] }
 0x834   :  { %3655 = vmatprep.subr.mxu1 %v3924_v4 }
 0x835   :  { %3656 = vmatpush3.msra.mxu1 %v2850_v32  ;;  %v2939_v32 = vld [vmem:[%s5478_s7 + $0x1d0] sm:$0xff] }
 0x836   :  { %3657 = vmatprep.subr.mxu1 %v3924_v4 }
 0x837   :  { %v1410_v34 = vpop.f32.mrf.mxu0  ;;  %3658 = vmatpush3.msra.mxu1 %v2849_v33  ;;  %v2938_v33 = vld [vmem:[%s5478_s7 + $0x1c8] sm:$0xff] }
 0x838   :  { %3660 = vmatmul.mubr.f32.vlgmr.msra.gmra.mxu1 %v4345_v28  ;;  %3697 = vmatprep.subr.mxu1 %v3924_v4  ;;  %v1411_v1 = vadd.f32 %v2848_v49, %v1410_v34  ;;  %v2937_v34 = vld [vmem:[%s5478_s7 + $0x1c0] sm:$0xff] }
 0x839   :  { %v3626_v35 = vpop.f32.mrf.mxu0  ;;  %3699 = vmatprep.mubr.msk.f32.mxu1 %vm3925_vm0, %v3924_v4 }
 0x83a   :  { %v2936_v35 = vld [vmem:[%s5478_s7 + $0x1b8] sm:$0xff] }
 0x857   :  { %v1600_v36 = vpop.f32.mrf.mxu0 }
 0x858   :  { %v1601_v53 = vadd.f32 %v2884_v51, %v1600_v36  ;;  %v2935_v36 = vld [vmem:[%s5478_s7 + $0x1b0] sm:$0xff]  ;;  %v2946_v51 = vld [vmem:[%s5479_s8 + $0x3] ss:$0 sm:$0xff] }
 0x859   :  { %v3696_v37 = vpop.f32.mrf.mxu0 }
 0x85a   :  { %v2934_v37 = vld [vmem:[%s5478_s7 + $0x1a8] sm:$0xff] }
 0x877   :  { %v2030_v39 = vpop.f32.mrf.mxu0 }
 0x878   :  { %v2031_v40 = vadd.f32 %v2928_v38, %v2030_v39  ;;  %v2933_v38 = vld [vmem:[%s5478_s7 + $0x1a0] sm:$0xff]  ;;  %v2932_v39 = vld [vmem:[%s5478_s7 + $0x198] sm:$0xff] }
 0x879   :  { %v3787_v41 = vpop.f32.mrf.mxu0 }
 0x87a   :  { %3824 = vmatpush3.xpose.msk.msra.mxu0 %vm547_vm1, %v2031_v40  ;;  %v2931_v40 = vld [vmem:[%s5478_s7 + $0x190] sm:$0xff]  ;;  %v2930_v41 = vld [vmem:[%s5478_s7 + $0x188] sm:$0xff] }
 0x87b   :  { %3828 = vmatprep.subr.mxu0 %v3924_v4 }
 0x8d8   :  { %v1314_v44 = vpop.f32.mrf.mxu1 }
 0x8d9   :  { %v4978_v45 = vadd.f32 %v1314_v44, %v793_v43 }
 0x8da   :  { %v3591_v46 = vpop.f32.mrf.mxu1 }
 0x8f8   :  { %v1505_v48 = vpop.f32.mrf.mxu1 }
 0x8f9   :  { %v1506_v50 = vadd.f32 %v2866_v47, %v1505_v48  ;;  %v2910_v47 = vld [vmem:[%s5509_s1 + $0x3] ss:$0 sm:$0xff] }
 0x8fa   :  { %v3661_v52 = vpop.f32.mrf.mxu1 }
 0x8fb   :  { %3698 = vmatpush3.xpose.msk.msra.mxu1 %vm547_vm1, %v1506_v50 }
 0x8fc   :  { %3702 = vmatprep.subr.mxu1 %v3924_v4 }
 0x8fe   :  { %3700 = vmatmul.mubr.msk.f32.vlgmr.msra.gmra.mxu1 %vm547_vm1, %v1411_v1 }
 0x8ff   :  { %3703 = vmatpush3.msra.mxu1 %v1601_v53  ;;  %3704 = vmatprep.mubr.msk.f32.mxu1 %vm3925_vm0, %v3924_v4 }
 0x900   :  { %3707 = vmatprep.subr.mxu1 %v3924_v4 }
 0x9be   :  { %v1676_v54 = vpop.f32.mrf.mxu1 }
 0x9bf   :  { %v1680_v55 = vmul.f32 0.17677669, %v1676_v54 }
 0x9c0   :  { %v3701_v56 = vpop.f32.mrf.mxu1 }
 0x9c1   :  { %v1681_v57 = vsel %vm625_vm2, %v1680_v55, -inf }
 0x9c2   :  { %1682 = vmax.xlane.f32.xlu0 %v1681_v57 }
 0xa4b   :  { %v1683_v58 = vpop.xlane.xlu0 %1682 }
 0xa4c   :  { %v1684_v59 = vsub.f32 %v1680_v55, %v1683_v58 }
 0xa4e   :  { %v1685_v60 = vmul.f32 1.442695, %v1684_v59 }
 0xa50   :  { %3890 = vpow2.f32 %v1685_v60 }
 0xa5d   :  { %v3891_v61 = vpop.eup %3890 }
 0xa5e   :  { %v1687_v62 = vsel %vm625_vm2, %v3891_v61, 0.0 }
 0xa5f   :  { %1688 = vadd.xlane.f32.xlu1 %v1687_v62  ;;  %v2953_v62 = vld [vmem:[%s5480_s9 + $0x78] sm:$0xff] }
 0xae8   :  { %v1689_v63 = vpop.xlane.xlu1 %1688 }
 0xae9   :  { %3892 = vrcp.f32 %v1689_v63  ;;  %v2952_v63 = vld [vmem:[%s5480_s9 + $0x70] sm:$0xff] }
 0xaf6   :  { %v3893_v0 = vpop.eup %3892 }
 0xaf7   :  { %v1691_v2 = vmul.f32 %v3893_v0, %v3891_v61  ;;  %v2951_v0 = vld [vmem:[%s5480_s9 + $0x68] sm:$0xff] }
 0xaf9   :  { %3705 = vmatmul.mubr.msk.f32.vlgmr.msra.gmra.mxu1 %vm625_vm2, %v1691_v2 }
 0xafa   :  { %3708 = vmatpush3.msra.mxu1 %v2891_v3  ;;  %3715 = vmatprep.mubr.msk.f32.mxu1 %vm3925_vm0, %v3924_v4 }
 0xafb   :  { %3709 = vmatprep.subr.mxu1 %v3924_v4 }
 0xafc   :  { %3710 = vmatpush3.msra.mxu1 %v2890_v5 }
 0xafd   :  { %3711 = vmatprep.subr.mxu1 %v3924_v4 }
 0xafe   :  { %3712 = vmatpush3.msra.mxu1 %v2889_v6  ;;  %v2950_v6 = vld [vmem:[%s5480_s9 + $0x60] sm:$0xff] }
 0xaff   :  { %3713 = vmatprep.subr.mxu1 %v3924_v4 }
 0xb00   :  { %3714 = vmatpush3.msra.mxu1 %v2888_v7 }
 0xb01   :  { %3718 = vmatprep.subr.mxu1 %v3924_v4 }
 0xbb9   :  { %v1761_v9 = vpop.f32.mrf.mxu1 }
 0xbba   :  { %3716 = vmatmul.mubr.msk.f32.vlgmr.msra.gmra.mxu1 %vm547_vm1, %v1761_v9 }
 0xbbb   :  { %3719 = vmatpush3.msra.mxu1 %v2908_v8  ;;  %v3706_v11 = vpop.f32.mrf.mxu1  ;;  %3750 = vmatprep.mubr.msk.f32.mxu1 %vm3925_vm0, %v3924_v4 }
 0xbbc   :  { %3720 = vmatprep.subr.mxu1 %v3924_v4 }
 0xbbd   :  { %3721 = vmatpush3.msra.mxu1 %v2907_v10 }
 0xbbe   :  { %3722 = vmatprep.subr.mxu1 %v3924_v4 }
 0xbbf   :  { %3723 = vmatpush3.msra.mxu1 %v2906_v12 }
 0xbc0   :  { %3724 = vmatprep.subr.mxu1 %v3924_v4 }
 0xbc1   :  { %3725 = vmatpush3.msra.mxu1 %v2905_v13  ;;  %v2429_v13 = vld [vmem:[%s5484_s13 + $0xf8] sm:$0xff] }
 0xbc2   :  { %3726 = vmatprep.subr.mxu1 %v3924_v4 }
 0xbc3   :  { %3727 = vmatpush3.msra.mxu1 %v2904_v14  ;;  %v2428_v14 = vld [vmem:[%s5484_s13 + $0xf0] sm:$0xff] }
 0xbc4   :  { %3728 = vmatprep.subr.mxu1 %v3924_v4 }
 0xbc5   :  { %3729 = vmatpush3.msra.mxu1 %v2903_v15  ;;  %v2427_v15 = vld [vmem:[%s5484_s13 + $0xe8] sm:$0xff] }
 0xbc6   :  { %3730 = vmatprep.subr.mxu1 %v3924_v4 }
 0xbc7   :  { %3731 = vmatpush3.msra.mxu1 %v2902_v16  ;;  %v2426_v16 = vld [vmem:[%s5484_s13 + $0xe0] sm:$0xff] }
 0xbc8   :  { %3732 = vmatprep.subr.mxu1 %v3924_v4 }
 0xbc9   :  { %3733 = vmatpush3.msra.mxu1 %v2901_v17  ;;  %v2424_v17 = vld [vmem:[%s5484_s13 + $0xd0] sm:$0xff] }
 0xbca   :  { %3734 = vmatprep.subr.mxu1 %v3924_v4 }
 0xbcb   :  { %3735 = vmatpush3.msra.mxu1 %v2900_v18  ;;  %v2423_v18 = vld [vmem:[%s5484_s13 + $0xc8] sm:$0xff] }
 0xbcc   :  { %3736 = vmatprep.subr.mxu1 %v3924_v4 }
 0xbcd   :  { %3737 = vmatpush3.msra.mxu1 %v2899_v19  ;;  %v2422_v19 = vld [vmem:[%s5484_s13 + $0xc0] sm:$0xff] }
 0xbce   :  { %3738 = vmatprep.subr.mxu1 %v3924_v4 }
 0xbcf   :  { %3739 = vmatpush3.msra.mxu1 %v2898_v20 }
 0xbd0   :  { %3740 = vmatprep.subr.mxu1 %v3924_v4 }
 0xbd1   :  { %3741 = vmatpush3.msra.mxu1 %v2897_v21 }
 0xbd2   :  { %3742 = vmatprep.subr.mxu1 %v3924_v4 }
 0xbd3   :  { %3743 = vmatpush3.msra.mxu1 %v2896_v22 }
 0xbd4   :  { %3744 = vmatprep.subr.mxu1 %v3924_v4 }
 0xbd5   :  { %3745 = vmatpush3.msra.mxu1 %v2895_v23 }
 0xbd6   :  { %3746 = vmatprep.subr.mxu1 %v3924_v4 }
 0xbd7   :  { %3747 = vmatpush3.msra.mxu1 %v2894_v24  ;;  %v2421_v24 = vld [vmem:[%s5484_s13 + $0xb8] sm:$0xff] }
 0xbd8   :  { %3748 = vmatprep.subr.mxu1 %v3924_v4 }
 0xbd9   :  { %3749 = vmatpush3.msra.mxu1 %v2893_v25  ;;  %v2420_v25 = vld [vmem:[%s5484_s13 + $0xb0] sm:$0xff] }
 0xbda   :  { %3751 = vmatmul.mubr.f32.vlgmr.msra.gmra.mxu1 %v4345_v28  ;;  %3788 = vmatprep.subr.mxu1 %v3924_v4 }
 0xbdb   :  { %3789 = vmatpush3.msra.mxu1 %v2944_v26  ;;  %3820 = vmatprep.mubr.msk.f32.mxu1 %vm3925_vm0, %v3924_v4  ;;  %v2419_v26 = vld [vmem:[%s5484_s13 + $0xa8] sm:$0xff] }
 0xbdc   :  { %3790 = vmatprep.subr.mxu1 %v3924_v4 }
 0xbdd   :  { %3791 = vmatpush3.msra.mxu1 %v2943_v27  ;;  %v2418_v27 = vld [vmem:[%s5484_s13 + $0xa0] sm:$0xff] }
 0xbde   :  { %3792 = vmatprep.subr.mxu1 %v3924_v4 }
 0xbdf   :  { %3793 = vmatpush3.msra.mxu1 %v2942_v29  ;;  %v2417_v29 = vld [vmem:[%s5484_s13 + $0x98] sm:$0xff] }
 0xbe0   :  { %3794 = vmatprep.subr.mxu1 %v3924_v4 }
 0xbe1   :  { %3795 = vmatpush3.msra.mxu1 %v2941_v30  ;;  %v2416_v30 = vld [vmem:[%s5484_s13 + $0x90] sm:$0xff] }
 0xbe2   :  { %3796 = vmatprep.subr.mxu1 %v3924_v4 }
 0xbe3   :  { %3797 = vmatpush3.msra.mxu1 %v2940_v31  ;;  %v2415_v31 = vld [vmem:[%s5484_s13 + $0x88] sm:$0xff] }
 0xbe4   :  { %3798 = vmatprep.subr.mxu1 %v3924_v4 }
 0xbe5   :  { %3799 = vmatpush3.msra.mxu1 %v2939_v32  ;;  %v2414_v32 = vld [vmem:[%s5484_s13 + $0x80] sm:$0xff] }
 0xbe6   :  { %3800 = vmatprep.subr.mxu1 %v3924_v4 }
 0xbe7   :  { %3801 = vmatpush3.msra.mxu1 %v2938_v33  ;;  %v2413_v33 = vld [vmem:[%s5484_s13 + $0x78] sm:$0xff] }
 0xbe8   :  { %3802 = vmatprep.subr.mxu1 %v3924_v4 }
 0xbe9   :  { %3803 = vmatpush3.msra.mxu1 %v2937_v34  ;;  %v2412_v34 = vld [vmem:[%s5484_s13 + $0x70] sm:$0xff] }
 0xbea   :  { %3804 = vmatprep.subr.mxu1 %v3924_v4 }
 0xbeb   :  { %3805 = vmatpush3.msra.mxu1 %v2936_v35  ;;  %v2411_v35 = vld [vmem:[%s5484_s13 + $0x68] sm:$0xff] }
 0xbec   :  { %3806 = vmatprep.subr.mxu1 %v3924_v4 }
 0xbed   :  { %3807 = vmatpush3.msra.mxu1 %v2935_v36  ;;  %v2410_v36 = vld [vmem:[%s5484_s13 + $0x60] sm:$0xff] }
 0xbee   :  { %3808 = vmatprep.subr.mxu1 %v3924_v4 }
 0xbef   :  { %3809 = vmatpush3.msra.mxu1 %v2934_v37  ;;  %v2409_v37 = vld [vmem:[%s5484_s13 + $0x58] sm:$0xff] }
 0xbf0   :  { %3810 = vmatprep.subr.mxu1 %v3924_v4 }
 0xbf1   :  { %3811 = vmatpush3.msra.mxu1 %v2933_v38  ;;  %v2408_v38 = vld [vmem:[%s5484_s13 + $0x50] sm:$0xff] }
 0xbf2   :  { %3812 = vmatprep.subr.mxu1 %v3924_v4 }
 0xbf3   :  { %3813 = vmatpush3.msra.mxu1 %v2932_v39  ;;  %v2407_v39 = vld [vmem:[%s5484_s13 + $0x48] sm:$0xff] }
 0xbf4   :  { %3814 = vmatprep.subr.mxu1 %v3924_v4 }
 0xbf5   :  { %3815 = vmatpush3.msra.mxu1 %v2931_v40  ;;  %v2406_v40 = vld [vmem:[%s5484_s13 + $0x40] sm:$0xff] }
 0xbf6   :  { %3816 = vmatprep.subr.mxu1 %v3924_v4 }
 0xbf7   :  { %3817 = vmatpush3.msra.mxu1 %v2930_v41  ;;  %v2405_v41 = vld [vmem:[%s5484_s13 + $0x38] sm:$0xff] }
 0xbf8   :  { %3818 = vmatprep.subr.mxu1 %v3924_v4 }
 0xbf9   :  { %3819 = vmatpush3.msra.mxu1 %v2929_v42  ;;  %v2404_v42 = vld [vmem:[%s5484_s13 + $0x30] sm:$0xff] }
 0xbfa   :  { %3821 = vmatmul.mubr.f32.vlgmr.msra.gmra.mxu1 %v4345_v28  ;;  %3833 = vmatprep.subr.mxu1 %v3924_v4 }
 0xbfb   :  { %3841 = vmatprep.mubr.msk.f32.mxu1 %vm3925_vm0, %v3924_v4  ;;  %3834 = vmatpush3.msra.mxu1 %v2953_v62  ;;  %v2539_v62 = vld [vmem:[%s5486_s15 + $0xc0] sm:$0xff] }
 0xbfc   :  { %3835 = vmatprep.subr.mxu1 %v3924_v4 }
 0xbfd   :  { %3836 = vmatpush3.msra.mxu1 %v2952_v63  ;;  %v2523_v63 = vld [vmem:[%s5486_s15 + $0x40] sm:$0xff] }
 0xbfe   :  { %3837 = vmatprep.subr.mxu1 %v3924_v4 }
 0xbff   :  { %3838 = vmatpush3.msra.mxu1 %v2951_v0  ;;  %v2538_v0 = vld [vmem:[%s5486_s15 + $0xb8] sm:$0xff] }
 0xc00   :  { %3839 = vmatprep.subr.mxu1 %v3924_v4 }
 0xc01   :  { %3840 = vmatpush3.msra.mxu1 %v2950_v6  ;;  %v2536_v6 = vld [vmem:[%s5486_s15 + $0xa8] sm:$0xff] }
 0xc7a   :  { %v1839_v43 = vpop.f32.mrf.mxu1 }
 0xc7b   :  { %v1843_v44 = vadd.f32 %v1839_v43, %v4978_v45  ;;  %v2403_v43 = vld [vmem:[%s5484_s13 + $0x28] sm:$0xff] }
 0xc7c   :  { %v3717_v46 = vpop.f32.mrf.mxu1 }
 0xc7d   :  { %v2401_v46 = vld [vmem:[%s5484_s13 + $0x18] sm:$0xff] }
 0xc9a   :  { %v1935_v48 = vpop.f32.mrf.mxu1 }
 0xc9b   :  { %v1936_v49 = vadd.f32 %v2910_v47, %v1935_v48  ;;  %v2400_v47 = vld [vmem:[%s5484_s13 + $0x10] sm:$0xff]  ;;  %v2399_v48 = vld [vmem:[%s5484_s13 + $0x8] sm:$0xff] }
 0xc9c   :  { %v3752_v50 = vpop.f32.mrf.mxu1 }
 0xc9d   :  { %3826 = vmatmul.mubr.msk.f32.vlgmr.msra.gmra.mxu0 %vm547_vm1, %v1936_v49  ;;  %v2398_v49 = vld [vmem:[%s5484_s13] sm:$0xff]  ;;  %v2546_v50 = vld [vmem:[%s5486_s15 + $0xf8] sm:$0xff] }
 0xc9e   :  { %3830 = vmatprep.mubr.msk.f32.mxu0 %vm3925_vm0, %v3924_v4  ;;  %3253 = vmatprep.subr.mxu1 %v2546_v50  ;;  %v2664_v50 = vld [vmem:[%s5490_s19 + $0x60] sm:$0xff] }
 0xcba   :  { %v2125_v52 = vpop.f32.mrf.mxu1 }
 0xcbb   :  { %v2126_v1 = vadd.f32 %v2946_v51, %v2125_v52  ;;  %v2530_v51 = vld [vmem:[%s5486_s15 + $0x78] sm:$0xff]  ;;  %v2545_v52 = vld [vmem:[%s5486_s15 + $0xf0] sm:$0xff] }
 0xcbc   :  { %v3822_v45 = vpop.f32.mrf.mxu1 }
 0xcbd   :  { %3829 = vmatpush3.msra.mxu0 %v2126_v1  ;;  %v2529_v1 = vld [vmem:[%s5486_s15 + $0x70] sm:$0xff]  ;;  %v2544_v45 = vld [vmem:[%s5486_s15 + $0xe8] sm:$0xff] }
 0xcbe   :  { %2442 = vmatprep.subr.mxu0 %v2429_v13 }
 0xd5d   :  { %v2201_v53 = vpop.f32.mrf.mxu0 }
 0xd5e   :  { %v2205_v54 = vmul.f32 0.17677669, %v2201_v53  ;;  %v2528_v53 = vld [vmem:[%s5486_s15 + $0x68] sm:$0xff] }
 0xd5f   :  { %v3827_v55 = vpop.f32.mrf.mxu0 }
 0xd60   :  { %v2206_v56 = vsel %vm625_vm2, %v2205_v54, -inf  ;;  %v2527_v55 = vld [vmem:[%s5486_s15 + $0x60] sm:$0xff] }
 0xd61   :  { %2207 = vmax.xlane.f32.xlu0 %v2206_v56  ;;  %v2542_v56 = vld [vmem:[%s5486_s15 + $0xd8] sm:$0xff] }
 0xdea   :  { %v2208_v57 = vpop.xlane.xlu0 %2207 }
 0xdeb   :  { %v2209_v58 = vsub.f32 %v2205_v54, %v2208_v57  ;;  %v2543_v54 = vld [vmem:[%s5486_s15 + $0xe0] sm:$0xff]  ;;  %v2526_v57 = vld [vmem:[%s5486_s15 + $0x58] sm:$0xff] }
 0xded   :  { %v2210_v59 = vmul.f32 1.442695, %v2209_v58  ;;  %v2541_v58 = vld [vmem:[%s5486_s15 + $0xd0] sm:$0xff] }
 0xdef   :  { %3894 = vpow2.f32 %v2210_v59  ;;  %v2525_v59 = vld [vmem:[%s5486_s15 + $0x50] sm:$0xff] }
 0xdfc   :  { %v3895_v60 = vpop.eup %3894 }
 0xdfd   :  { %v2212_v61 = vsel %vm625_vm2, %v3895_v60, 0.0 }
 0xdfe   :  { %2213 = vadd.xlane.f32.xlu1 %v2212_v61  ;;  %v2524_v61 = vld [vmem:[%s5486_s15 + $0x48] sm:$0xff] }
 0xe87   :  { %v2214_v2 = vpop.xlane.xlu1 %2213 }
 0xe88   :  { %3896 = vrcp.f32 %v2214_v2  ;;  %v2522_v2 = vld [vmem:[%s5486_s15 + $0x38] sm:$0xff] }
 0xe95   :  { %v3897_v3 = vpop.eup %3896 }
 0xe96   :  { %v2216_v5 = vmul.f32 %v3897_v3, %v3895_v60  ;;  %v2540_v60 = vld [vmem:[%s5486_s15 + $0xc8] sm:$0xff]  ;;  %v2537_v3 = vld [vmem:[%s5486_s15 + $0xb0] sm:$0xff] }
 0xe98   :  { %3831 = vmatmul.mubr.msk.f32.vlgmr.msra.gmra.mxu0 %vm625_vm2, %v2216_v5  ;;  %v2521_v5 = vld [vmem:[%s5486_s15 + $0x30] sm:$0xff] }
 0xe99   :  { %2506 = vmatprep.mubr.f32.mxu0 %v3924_v4  ;;  %2443 = vmatpush1.msra.mxu0 %v2428_v14  ;;  %v2955_v14 = vld [vmem:[%s5482_s11] ss:$0 sm:$0xff] }
 0xe9a   :  { %2444 = vmatprep.subr.mxu0 %v2427_v15 }
 0xe9b   :  { %2445 = vmatpush1.msra.mxu0 %v2426_v16  ;;  %v2956_v16 = vld [vmem:[%s5483_s12] ss:$0 sm:$0xff]  ;;  %s2752_s12 = sshll.u32 %s3926_s6, 4  ;;  %s2753_s12 = int_to_ptr.vmem [resolvable:$true] %s2752_s12 }
 0xe9c   :  { %p3907_p1 = scmp.lt.s32.totalorder %s2753_s12, %s2753_s12 }
 0xf58   :  { %v2286_v7 = vpop.f32.mrf.mxu0 }
 0xf59   :  { %3842 = vmatmul.mubr.msk.f32.vlgmr.msra.gmra.mxu1 %vm547_vm1, %v2286_v7  ;;  %v2520_v7 = vld [vmem:[%s5486_s15 + $0x28] sm:$0xff] }
 0xf5a   :  { %v3832_v8 = vpop.f32.mrf.mxu0  ;;  %3254 = vmatpush3.msra.mxu1 %v2530_v51 }
 0xf5b   :  { %3255 = vmatprep.subr.mxu1 %v2545_v52  ;;  %v2535_v8 = vld [vmem:[%s5486_s15 + $0xa0] sm:$0xff] }
 0xf5c   :  { %3256 = vmatpush3.msra.mxu1 %v2529_v1 }
 0xf5d   :  { %3257 = vmatprep.subr.mxu1 %v2544_v45 }
 0xf5e   :  { %3258 = vmatpush3.msra.mxu1 %v2528_v53  ;;  %v2663_v53 = vld [vmem:[%s5490_s19 + $0x58] sm:$0xff] }
 0xf5f   :  { %3259 = vmatprep.subr.mxu1 %v2543_v54  ;;  %v2662_v54 = vld [vmem:[%s5490_s19 + $0x50] sm:$0xff] }
 0xf60   :  { %3260 = vmatpush3.msra.mxu1 %v2527_v55  ;;  %v2661_v55 = vld [vmem:[%s5490_s19 + $0x48] sm:$0xff] }
 0xf61   :  { %3261 = vmatprep.subr.mxu1 %v2542_v56  ;;  %v2660_v56 = vld [vmem:[%s5490_s19 + $0x40] sm:$0xff] }
 0xf62   :  { %3262 = vmatpush3.msra.mxu1 %v2526_v57  ;;  %v2659_v57 = vld [vmem:[%s5490_s19 + $0x38] sm:$0xff] }
 0xf63   :  { %3263 = vmatprep.subr.mxu1 %v2541_v58  ;;  %v2658_v58 = vld [vmem:[%s5490_s19 + $0x30] sm:$0xff] }
 0xf64   :  { %3264 = vmatpush3.msra.mxu1 %v2525_v59  ;;  %v2657_v59 = vld [vmem:[%s5490_s19 + $0x28] sm:$0xff] }
 0xf65   :  { %3265 = vmatprep.subr.mxu1 %v2540_v60  ;;  %v2656_v60 = vld [vmem:[%s5490_s19 + $0x20] sm:$0xff] }
 0xf66   :  { %3266 = vmatpush3.msra.mxu1 %v2524_v61  ;;  %v2655_v61 = vld [vmem:[%s5490_s19 + $0x18] sm:$0xff] }
 0xf67   :  { %3267 = vmatprep.subr.mxu1 %v2539_v62  ;;  %v2654_v62 = vld [vmem:[%s5490_s19 + $0x10] sm:$0xff] }
 0xf68   :  { %3268 = vmatpush3.msra.mxu1 %v2523_v63  ;;  %v2653_v63 = vld [vmem:[%s5490_s19 + $0x8] sm:$0xff] }
 0xf69   :  { %3269 = vmatprep.subr.mxu1 %v2538_v0  ;;  %v2652_v0 = vld [vmem:[%s5490_s19] sm:$0xff] }
 0xf6a   :  { %3270 = vmatpush3.msra.mxu1 %v2522_v2 }
 0xf6b   :  { %3271 = vmatprep.subr.mxu1 %v2537_v3 }
 0xf6c   :  { %3272 = vmatpush3.msra.mxu1 %v2521_v5 }
 0xf6d   :  { %3273 = vmatprep.subr.mxu1 %v2536_v6 }
 0xf6e   :  { %3274 = vmatpush3.msra.mxu1 %v2520_v7  ;;  %v2958_v7 = vld [vmem:[%s5488_s17] ss:$0 sm:$0xff]  ;;  %s3902_s17 = scalar_lea.vmem %s2753_s12, 128 }
 0xf6f   :  { %3275 = vmatprep.subr.mxu1 %v2535_v8  ;;  %p3903_p0 = scmp.ne.s32.totalorder %s2753_s12, %s3902_s17  ;;  %p3908_p2 = scmp.lt.s32.totalorder %s3902_s17, %s3902_s17 }
 0xf71   :  { %p3909_p3 = por %p3908_p2, %p3907_p1 }
 0xf73   :  { %p3910_p4 = pnand %p3909_p3, %p3903_p0 }
0x1019   :  { %v2364_v9 = vpop.f32.mrf.mxu1 }
0x101a   :  { %v2368_v10 = vadd.f32 %v2364_v9, %v1843_v44  ;;  %v2402_v44 = vld [vmem:[%s5484_s13 + $0x20] sm:$0xff] }
0x101b   :  { %v3843_v11 = vpop.f32.mrf.mxu1  ;;  %v2519_v9 = vld [vmem:[%s5486_s15 + $0x20] sm:$0xff] }
0x101c   :  { %v2369_v12 = vadd.f32 %v2368_v10, %v4345_v28  ;;  %v2425_v28 = vld [vmem:[%s5484_s13 + $0xd8] sm:$0xff]  ;;  %3276 = vmatpush3.msra.mxu1 %v2519_v9  ;;  %v2959_v9 = vld [vmem:[%s5489_s18] ss:$0 sm:$0xff] }
0x101d   :  { %2446 = vmatprep.subr.mxu0 %v2425_v28 }
0x101e   :  { %2372 = vadd.xlane.f32.xlu0 %v2369_v12  ;;  %2447 = vmatpush1.msra.mxu0 %v2424_v17 }
0x101f   :  { %2448 = vmatprep.subr.mxu0 %v2423_v18  ;;  %v2534_v18 = vld [vmem:[%s5486_s15 + $0x98] sm:$0xff] }
0x1020   :  { %2449 = vmatpush1.msra.mxu0 %v2422_v19  ;;  %3277 = vmatprep.subr.mxu1 %v2534_v18  ;;  %v2518_v19 = vld [vmem:[%s5486_s15 + $0x18] sm:$0xff] }
0x1021   :  { %2450 = vmatprep.subr.mxu0 %v2421_v24  ;;  %3278 = vmatpush3.msra.mxu1 %v2518_v19  ;;  %v2531_v24 = vld [vmem:[%s5486_s15 + $0x80] sm:$0xff] }
0x1022   :  { %2451 = vmatpush1.msra.mxu0 %v2420_v25  ;;  %v2515_v25 = vld [vmem:[%s5486_s15] sm:$0xff] }
0x1023   :  { %2452 = vmatprep.subr.mxu0 %v2419_v26  ;;  %v2432_v26 = vlaneseq }
0x1024   :  { %2453 = vmatpush1.msra.mxu0 %v2418_v27 }
0x1025   :  { %2454 = vmatprep.subr.mxu0 %v2417_v29  ;;  %v2433_v27 = vshrl.u32 %v2432_v26, 7 }
0x1026   :  { %2455 = vmatpush1.msra.mxu0 %v2416_v30  ;;  %v2430_v30 = vld [vmem:[%s5485_s14] sm:$0x3] }
0x1027   :  { %2456 = vmatprep.subr.mxu0 %v2415_v31  ;;  %v2434_v29 = vsub.s32 0, %v2433_v27  ;;  %v2438_v31 = vsub.s32 1, %v2433_v27 }
0x1028   :  { %2457 = vmatpush1.msra.mxu0 %v2414_v32 }
0x1029   :  { %2458 = vmatprep.subr.mxu0 %v2413_v33  ;;  %v2435_v32 = vrot.slane %v2430_v30, %v2434_v29  ;;  %v2439_v33 = vrot.slane %v2430_v30, %v2438_v31 }
0x102a   :  { %2459 = vmatpush1.msra.mxu0 %v2412_v34 }
0x102b   :  { %2460 = vmatprep.subr.mxu0 %v2411_v35 }
0x102c   :  { %2461 = vmatpush1.msra.mxu0 %v2410_v36 }
0x102d   :  { %2462 = vmatprep.subr.mxu0 %v2409_v37 }
0x102e   :  { %2463 = vmatpush1.msra.mxu0 %v2408_v38 }
0x102f   :  { %2464 = vmatprep.subr.mxu0 %v2407_v39 }
0x1030   :  { %2465 = vmatpush1.msra.mxu0 %v2406_v40 }
0x1031   :  { %2466 = vmatprep.subr.mxu0 %v2405_v41  ;;  %v2957_v41 = vld [vmem:[%s5487_s16] ss:$0 sm:$0xff] }
0x1032   :  { %2467 = vmatpush1.msra.mxu0 %v2404_v42 }
0x1033   :  { %2468 = vmatprep.subr.mxu0 %v2403_v43 }
0x1034   :  { %2469 = vmatpush1.msra.mxu0 %v2402_v44 }
0x1035   :  { %2470 = vmatprep.subr.mxu0 %v2401_v46 }
0x1036   :  { %2471 = vmatpush1.msra.mxu0 %v2400_v47  ;;  %v2667_v47 = vld [vmem:[%s5490_s19 + $0x78] sm:$0xff] }
0x1037   :  { %2472 = vmatprep.subr.mxu0 %v2399_v48  ;;  %v2666_v48 = vld [vmem:[%s5490_s19 + $0x70] sm:$0xff] }
0x1038   :  { %2473 = vmatpush1.msra.mxu0 %v2398_v49  ;;  %v2665_v49 = vld [vmem:[%s5490_s19 + $0x68] sm:$0xff] }
0x1039   :  { %3844 = vmatprep.subr.mxu0 %v3924_v4 }
0x10a7   :  { %v2373_v20 = vpop.xlane.xlu0 %2372 }
0x10a8   :  { %v2375_v21 = vmul.f32 0.0078125, %v2373_v20  ;;  %v2533_v20 = vld [vmem:[%s5486_s15 + $0x90] sm:$0xff] }
0x10a9   :  { %3279 = vmatprep.subr.mxu1 %v2533_v20 }
0x10aa   :  { %v5208_v22 = vsub.f32 %v2369_v12, %v2375_v21  ;;  %v2517_v21 = vld [vmem:[%s5486_s15 + $0x10] sm:$0xff] }
0x10ab   :  { %3280 = vmatpush3.msra.mxu1 %v2517_v21 }
0x10ac   :  { %v2377_v23 = vmul.f32 %v5208_v22, %v5208_v22 }
0x10ae   :  { %2378 = vadd.xlane.f32.xlu1 %v2377_v23  ;;  %v2516_v23 = vld [vmem:[%s5486_s15 + $0x8] sm:$0xff] }
0x1137   :  { %v2379_v10 = vpop.xlane.xlu1 %2378 }
0x1138   :  { %v2380_v11 = vmul.f32 0.0078125, %v2379_v10 }
0x113a   :  { %v2381_v12 = vadd.f32 1e-05, %v2380_v11 }
0x113c   :  { %3898 = vrsqrt.f32 %v2381_v12 }
0x1149   :  { %v3899_v13 = vpop.eup %3898 }
0x114a   :  { %v2383_v15 = vmul.f32 %v3899_v13, %v5208_v22  ;;  %v2532_v22 = vld [vmem:[%s5486_s15 + $0x88] sm:$0xff] }
0x114b   :  { %3281 = vmatprep.subr.mxu1 %v2532_v22 }
0x114c   :  { %v2390_v28 = vmul.f32 %v2955_v14, %v2383_v15  ;;  %3282 = vmatpush3.msra.mxu1 %v2516_v23 }
0x114d   :  { %3283 = vmatprep.subr.mxu1 %v2531_v24 }
0x114e   :  { %v2397_v17 = vadd.f32 %v2956_v16, %v2390_v28  ;;  %3284 = vmatpush3.msra.mxu1 %v2515_v25 }
0x1150   :  { %2507 = vmatmul.mubr.f32.vlgmr.msra.gmra.mxu0 %v2397_v17 }
0x1151   :  { %3876 = vmatprep.mubr.msk.f32.mxu0 %vm3925_vm0, %v3924_v4  ;;  %3845 = vmatpush3.msra.mxu0 %v2667_v47 }
0x1152   :  { %3846 = vmatprep.subr.mxu0 %v3924_v4 }
0x1153   :  { %3847 = vmatpush3.msra.mxu0 %v2666_v48 }
0x1154   :  { %3848 = vmatprep.subr.mxu0 %v3924_v4 }
0x1155   :  { %3849 = vmatpush3.msra.mxu0 %v2665_v49 }
0x1156   :  { %3850 = vmatprep.subr.mxu0 %v3924_v4 }
0x1157   :  { %3851 = vmatpush3.msra.mxu0 %v2664_v50 }
0x1158   :  { %3852 = vmatprep.subr.mxu0 %v3924_v4 }
0x1159   :  { %3853 = vmatpush3.msra.mxu0 %v2663_v53 }
0x115a   :  { %3854 = vmatprep.subr.mxu0 %v3924_v4 }
0x115b   :  { %3855 = vmatpush3.msra.mxu0 %v2662_v54 }
0x115c   :  { %3856 = vmatprep.subr.mxu0 %v3924_v4 }
0x115d   :  { %3857 = vmatpush3.msra.mxu0 %v2661_v55 }
0x115e   :  { %3858 = vmatprep.subr.mxu0 %v3924_v4 }
0x115f   :  { %3859 = vmatpush3.msra.mxu0 %v2660_v56 }
0x1160   :  { %3860 = vmatprep.subr.mxu0 %v3924_v4 }
0x1161   :  { %3861 = vmatpush3.msra.mxu0 %v2659_v57 }
0x1162   :  { %3862 = vmatprep.subr.mxu0 %v3924_v4 }
0x1163   :  { %3863 = vmatpush3.msra.mxu0 %v2658_v58 }
0x1164   :  { %3864 = vmatprep.subr.mxu0 %v3924_v4 }
0x1165   :  { %3865 = vmatpush3.msra.mxu0 %v2657_v59 }
0x1166   :  { %3866 = vmatprep.subr.mxu0 %v3924_v4 }
0x1167   :  { %3867 = vmatpush3.msra.mxu0 %v2656_v60 }
0x1168   :  { %3868 = vmatprep.subr.mxu0 %v3924_v4 }
0x1169   :  { %3869 = vmatpush3.msra.mxu0 %v2655_v61 }
0x116a   :  { %3870 = vmatprep.subr.mxu0 %v3924_v4 }
0x116b   :  { %3871 = vmatpush3.msra.mxu0 %v2654_v62 }
0x116c   :  { %3872 = vmatprep.subr.mxu0 %v3924_v4 }
0x116d   :  { %3873 = vmatpush3.msra.mxu0 %v2653_v63 }
0x116e   :  { %3874 = vmatprep.subr.mxu0 %v3924_v4  ;;  %v2960_v4 = vld [vmem:[%s5491_s20] ss:$0 sm:$0xff] }
0x116f   :  { %3875 = vmatpush3.msra.mxu0 %v2652_v0 }
0x1210   :  { %v2508_v34 = vpop.f32.mrf.mxu0 }
0x1211   :  { %v2509_v35 = vadd.f32 %v2508_v34, %v2435_v32 }
0x1212   :  { %v2510_v36 = vpop.f32.mrf.mxu0 }
0x1213   :  { %v2511_v37 = vadd.f32 %v2510_v36, %v2439_v33  ;;  %v2513_v39 = vmax.f32 %v2509_v35, 0.0 }
0x1215   :  { %v2514_v38 = vmax.f32 %v2511_v37, 0.0 }
0x1217   :  { %2618 = vmatprep.mubr.f32.mxu1 %v2514_v38 }
0x1218   :  { %2619 = vmatmul.mubr.f32.vlgmr.msra.gmra.mxu1 %v2513_v39 }
0x12d8   :  { %v3285_v40 = vpop.f32.mrf.mxu1 }
0x12da   :  { %v3286_v42 = vpop.f32.mrf.mxu1 }
0x12db   :  { %v3287_v43 = vadd.f32 %v3286_v42, %v3285_v40 }
0x12dd   :  { %v2621_v44 = vadd.f32 %v3287_v43, %v2957_v41 }
0x12df   :  { %v2624_v46 = vadd.f32 %v2621_v44, %v2397_v17 }
0x12e1   :  { %2627 = vadd.xlane.f32.xlu0 %v2624_v46 }
0x136a   :  { %v2628_v51 = vpop.xlane.xlu0 %2627 }
0x136b   :  { %v2629_v52 = vmul.f32 0.0078125, %v2628_v51 }
0x136d   :  { %v2630_v1 = vsub.f32 %v2624_v46, %v2629_v52 }
0x136f   :  { %v2631_v45 = vmul.f32 %v2630_v1, %v2630_v1 }
0x1371   :  { %2632 = vadd.xlane.f32.xlu1 %v2631_v45 }
0x13fa   :  { %v2633_v2 = vpop.xlane.xlu1 %2632 }
0x13fb   :  { %v2634_v3 = vmul.f32 0.0078125, %v2633_v2 }
0x13fd   :  { %v2635_v5 = vadd.f32 1e-05, %v2634_v3 }
0x13ff   :  { %3900 = vrsqrt.f32 %v2635_v5 }
0x140c   :  { %v3901_v6 = vpop.eup %3900 }
0x140d   :  { %v2637_v8 = vmul.f32 %v3901_v6, %v2630_v1 }
0x140f   :  { %v2644_v10 = vmul.f32 %v2958_v7, %v2637_v8 }
0x1411   :  { %v2651_v11 = vadd.f32 %v2959_v9, %v2644_v10 }
0x1413   :  { %3877 = vmatmul.mubr.f32.vlgmr.msra.gmra.mxu0 %v2651_v11 }
0x14d3   :  { %v2741_v12 = vpop.f32.mrf.mxu0 }
0x14d4   :  { %v2742_v13 = vadd.f32 %v2960_v4, %v2741_v12 }
0x14d5   :  { %v3878_v14 = vpop.f32.mrf.mxu0 }
0x14d6   :  { %2745 = vst [vmem:[#allocation2] sm:$0xff] %v2742_v13 }
0x14d7   :  { %3913 = shalt.err (!%p3910_p4)
}
0x14d8   :  { %2755 = dma.vmem_to_hbm [thread:$0]  %s2753_s12, 128, %s5492_s21, [#allocation3]  }
0x14d9   :  { %3922 = dma.done.wait [#allocation3], 128  }
0x14da   :  { %3923 = vsyncadd [#allocation3], 4294967168 }
0x14db   :  { %2759 = vsyncpa [#allocation3], 1 }

</bundles_post_ra>
